<compile_context>
chip_gen: v7x
topology: tpu7x:2x2x1
jax: 0.10.0
libtpu: 0.0.40
codegen_flags: <defaults>
</compile_context>

<pallas_src>
import functools

import jax
import jax.numpy as jnp
from jax import lax
from jax.experimental import pallas as pl
from jax.experimental.pallas import tpu as pltpu


def _cdiv(a, b):
    return -(-a // b)


def _vmem_budget():
    """Per-generation (row_tile_bytes, vmem_limit_bytes).

    v5e/v6e (128 MiB VMEM) -> ~96 MiB limit, ~8 MiB row tiles.
    v7x     ( 64 MiB VMEM) -> ~48 MiB limit, ~4 MiB row tiles.
    Working set per step ~= 2x in + 2x out double buffers + ~4 f32 full-tile
    temporaries + halo/params, i.e. ~8-9x the row tile -> budget = limit / 12.
    """
    vmem_cap = 64 * 1024 * 1024          # conservative default (v7x per-core)
    try:
        info = pltpu.get_tpu_info()
        vmem_cap = int(getattr(info, "vmem_capacity_bytes", vmem_cap))
    except Exception:                    # non-TPU tracing / older runtimes
        pass
    vmem_limit = max(min((vmem_cap * 3) // 4, 96 * 1024 * 1024),
                     32 * 1024 * 1024)
    row_tile_bytes = max(vmem_limit // 12, 512 * 1024)
    return row_tile_bytes, vmem_limit


def _pick_row_tile(H, bytes_per_row, row_tile_bytes, batch):
    """Row-tile height TH.

    TH is the largest multiple of 8 whose tile fits the byte budget (TH == H
    means whole image per grid step).  TH need NOT divide H: the grid uses
    cdiv(H, TH), the kernel masks the bottom boundary and Pallas clips the
    trailing partial output write.
    """
    max_rows = max(1, row_tile_bytes // max(1, bytes_per_row))
    if max_rows >= H:
        th = H
    elif H < 8:
        th = H                                    # too small for 8-row tiling
    else:
        # NOTE: for extremely wide rows the 8-row minimum may slightly exceed
        # the requested budget; the vmem limit has ~3-4x headroom over it.
        th = max(8, (max_rows // 8) * 8)
    # v7x has 2 TensorCores: make sure the (batch, rows) grid has >= 2 steps.
    if batch * _cdiv(H, th) < 2 and H >= 16:
        th = 8 * _cdiv(_cdiv(H, 2), 8)            # multiple of 8, < H
    return th


def _dwconv3x3_body(x_ref, top_ref, bot_ref, w_ref, b_ref, o_ref, *,
                    C, H, TH, tap_dtype):
    """Depthwise 3x3 conv (stride 1, pad 1) on a lane-dense (rows, W*C) tile.

    x_ref   : (TH, W*C)    row tile (TH image rows, each flattened to W*C lanes)
    top_ref : (1, 1, W*C)  the single image row above the tile (None when the
                           tile covers the whole image height)
    bot_ref : (1, 1, W*C)  the single image row below the tile
    w_ref   : (3, 3, W*C)  per-channel 3x3 weights, pre-tiled across W (f32)
    b_ref   : (1, W*C)     per-channel bias, pre-tiled across W (f32)
    o_ref   : (TH, W*C)    output tile
    """
    x = x_ref[...].astype(tap_dtype)                  # single load of the tile
    _, WC = x.shape

    if top_ref is None:
        # Whole image in one tile: the dy halo is the conv zero padding.
        zero_row = jnp.zeros((1, WC), tap_dtype)
        up = jnp.concatenate([zero_row, x[:-1, :]], axis=0)
        dn = jnp.concatenate([x[1:, :], zero_row], axis=0)
    else:
        top = top_ref[0].astype(tap_dtype)            # (1, WC): row above tile
        bot = bot_ref[0].astype(tap_dtype)            # (1, WC): row below tile
        up = jnp.concatenate([top, x[:-1, :]], axis=0)
        dn = jnp.concatenate([x[1:, :], bot], axis=0)
        # Global-row mask: zeroes the dy halo at the image top/bottom and also
        # masks the garbage "row below" inside a trailing partial tile, so TH
        # does not have to divide H.
        grow = (pl.program_id(1) * TH
                + lax.broadcasted_iota(jnp.int32, (TH, 1), 0))
        up = jnp.where(grow > 0, up, 0)
        dn = jnp.where(grow < H - 1, dn, 0)

    # dx = -1 / +1 : +-C lane splices.  The W edges of every row are exactly
    # the conv zero padding, so the fill is unconditionally zero.
    TH_rows = x.shape[0]
    zero_col = jnp.zeros((TH_rows, C), tap_dtype)

    def shift_to_left(v):    # value of pixel j+1 presented at pixel j
        return jnp.concatenate([v[:, C:], zero_col], axis=1)

    def shift_to_right(v):   # value of pixel j-1 presented at pixel j
        return jnp.concatenate([zero_col, v[:, :WC - C]], axis=1)

    wk = w_ref[...].astype(tap_dtype)                 # (3, 3, WC)
    acc = jnp.zeros((TH_rows, WC), jnp.float32)       # f32 accumulation
    for dy, row in enumerate((up, x, dn)):            # unrolled 9-tap accumulate
        acc += (shift_to_right(row) * wk[dy, 0]).astype(jnp.float32)
        acc += (row * wk[dy, 1]).astype(jnp.float32)
        acc += (shift_to_left(row) * wk[dy, 2]).astype(jnp.float32)
    acc += b_ref[...]
    o_ref[...] = acc.astype(o_ref.dtype)


def _make_kernel(*, C, H, TH, tap_dtype, halo):
    if halo:
        def kernel(x_ref, top_ref, bot_ref, w_ref, b_ref, o_ref):
            _dwconv3x3_body(x_ref, top_ref, bot_ref, w_ref, b_ref, o_ref,
                            C=C, H=H, TH=TH, tap_dtype=tap_dtype)
    else:
        def kernel(x_ref, w_ref, b_ref, o_ref):
            _dwconv3x3_body(x_ref, None, None, w_ref, b_ref, o_ref,
                            C=C, H=H, TH=TH, tap_dtype=tap_dtype)
    return kernel


def dwconv3x3(x_nhwc, w, b, *, row_tile_bytes=None, vmem_limit_bytes=None,
              bf16_taps=True):
    """Depthwise 3x3 conv, stride 1, pad 1, groups=C.

    x_nhwc : (B, H, W, C)
    w      : (3, 3, C)   with w[ky, kx, c] == torch_weight[c, 0, ky, kx]
    b      : (C,)
    """
    B, H, W, C = x_nhwc.shape
    WC = W * C
    x = x_nhwc.reshape(B, H, WC)             # free reshape: lane-dense layout

    default_tile, default_limit = _vmem_budget()
    if row_tile_bytes is None:
        row_tile_bytes = default_tile
    if vmem_limit_bytes is None:
        vmem_limit_bytes = default_limit

    # Per-channel params tiled to lane width once (tiny: 10 * W * C floats).
    w_lane = jnp.tile(w.astype(jnp.float32), (1, 1, W))        # (3, 3, WC)
    b_lane = jnp.tile(b.astype(jnp.float32), W)[None, :]       # (1, WC)

    itemsize = jnp.dtype(x.dtype).itemsize
    TH = _pick_row_tile(H, WC * itemsize, row_tile_bytes, B)
    halo = TH < H
    num_row_tiles = _cdiv(H, TH)

    # bf16 tap multiplies (f32 accumulation) when activations are bf16:
    # packed VPU math on v6e/v7x.  Pass bf16_taps=False on v5e (no bf16 VALU).
    tap_dtype = jnp.float32
    if bf16_taps and x.dtype == jnp.bfloat16:
        tap_dtype = jnp.bfloat16

    in_specs = [pl.BlockSpec((None, TH, WC), lambda bb, rr: (bb, rr, 0))]
    inputs = [x]
    if halo:
        # Single-row halo side-loads: the (B, H, 1, W*C) view makes the block's
        # last two dims equal the full array dims, so a 1-row block is legal
        # and each grid step re-reads only 2 halo rows from HBM.
        x_rows = x.reshape(B, H, 1, WC)
        in_specs += [
            # The image row just above this tile (clamped; masked in-kernel).
            pl.BlockSpec((None, 1, 1, WC),
                         lambda bb, rr: (bb, jnp.maximum(rr * TH - 1, 0), 0, 0)),
            # The image row just below this tile (clamped; masked in-kernel).
            pl.BlockSpec((None, 1, 1, WC),
                         lambda bb, rr: (bb, jnp.minimum((rr + 1) * TH, H - 1), 0, 0)),
        ]
        inputs += [x_rows, x_rows]
    in_specs += [
        pl.BlockSpec((3, 3, WC), lambda bb, rr: (0, 0, 0)),
        pl.BlockSpec((1, WC), lambda bb, rr: (0, 0)),
    ]
    inputs += [w_lane, b_lane]

    out = pl.pallas_call(
        _make_kernel(C=C, H=H, TH=TH, tap_dtype=tap_dtype, halo=halo),
        out_shape=jax.ShapeDtypeStruct((B, H, WC), x.dtype),
        grid_spec=pltpu.PrefetchScalarGridSpec(
            num_scalar_prefetch=0,
            grid=(B, num_row_tiles),
            in_specs=in_specs,
            out_specs=pl.BlockSpec((None, TH, WC), lambda bb, rr: (bb, rr, 0)),
        ),
        compiler_params=pltpu.CompilerParams(
            dimension_semantics=("parallel", "parallel"),
            vmem_limit_bytes=vmem_limit_bytes,
        ),
    )(*inputs)
    return out.reshape(B, H, W, C)


def dwconv_forward(x, H, W, w, b, *, row_tile_bytes=None, vmem_limit_bytes=None,
                   bf16_taps=True):
    """Pallas equivalent of DWConv.forward.

    x : (B, N, C) with N == 21 * n, n == (H * W) // 4
    w : (3, 3, C) depthwise filters; b : (C,) bias
    returns (B, N, C)
    """
    B, N, C = x.shape
    assert N % 21 == 0, f"N={N} must be divisible by 21"
    assert H % 2 == 0 and W % 2 == 0, f"H={H}, W={W} must be even"
    n = N // 21
    assert n == (H * W) // 4, f"n={n} inconsistent with H={H}, W={W}"

    def one_scale(tokens, h, w_):
        xh = tokens.reshape(B, h, w_, C)      # free reshape (row-major tokens)
        yh = dwconv3x3(xh, w, b, row_tile_bytes=row_tile_bytes,
                       vmem_limit_bytes=vmem_limit_bytes, bf16_taps=bf16_taps)
        return yh.reshape(B, h * w_, C)

    # TODO(synk): write the three scales straight into one (B, N, C) buffer
    # (input_output_aliases + per-scale row offsets) to drop the trailing
    # concatenate's extra HBM pass; blocked on the per-scale lane width W*C
    # differing, which BlockSpec block shapes require to be static & uniform.
    y1 = one_scale(x[:, 0:16 * n, :], H * 2, W * 2)
    y2 = one_scale(x[:, 16 * n:20 * n, :], H, W)
    y3 = one_scale(x[:, 20 * n:, :], H // 2, W // 2)
    return jnp.concatenate([y1, y2, y3], axis=1)


def _reference_dwconv_forward(x, H, W, w, b):
    """Pure-JAX reference using lax.conv (NCHW, groups=C), mirrors the torch code."""
    B, N, C = x.shape
    n = N // 21

    def conv_nchw(tokens, h, w_):
        xi = jnp.transpose(tokens, (0, 2, 1)).reshape(B, C, h, w_)
        k = jnp.transpose(w, (2, 0, 1))[:, None, :, :]         # (C, 1, 3, 3)
        y = lax.conv_general_dilated(
            xi, k, window_strides=(1, 1), padding=((1, 1), (1, 1)),
            dimension_numbers=("NCHW", "OIHW", "NCHW"),
            feature_group_count=C, precision=lax.Precision.HIGHEST)
        y = y + b[None, :, None, None]
        return jnp.transpose(y.reshape(B, C, h * w_), (0, 2, 1))

    y1 = conv_nchw(x[:, 0:16 * n, :], H * 2, W * 2)
    y2 = conv_nchw(x[:, 16 * n:20 * n, :], H, W)
    y3 = conv_nchw(x[:, 20 * n:, :], H // 2, W // 2)
    return jnp.concatenate([y1, y2, y3], axis=1)


if __name__ == "__main__":
    # Shapes consistent with the module: x is (B, 21*n, C), n = (H*W)//4.
    B, C = 2, 32
    H, W = 8, 8                      # pyramid scales: 16x16, 8x8, 4x4
    n = (H * W) // 4
    N = 21 * n                       # 336

    key = jax.random.PRNGKey(0)
    kx, kw, kb = jax.random.split(key, 3)
    x = jax.random.normal(kx, (B, N, C), dtype=jnp.float32)
    # nn.Conv2d(dim, dim, 3, groups=dim, bias=True): torch weight (C,1,3,3)
    # stored here as (3, 3, C); bias (C,).
    w = jax.random.normal(kw, (3, 3, C), dtype=jnp.float32) * 0.1
    b = jax.random.normal(kb, (C,), dtype=jnp.float32) * 0.1

    ref = _reference_dwconv_forward(x, H, W, w, b)

    # 1) Default path (per-generation tile budget; whole image per step here).
    fwd = jax.jit(functools.partial(dwconv_forward, H=H, W=W))
    out = fwd(x, w=w, b=b)
    jax.block_until_ready(out)
    assert out.shape == (B, N, C), out.shape
    assert jnp.allclose(out, ref, atol=1e-4, rtol=1e-4), "mismatch (default path)"

    # 2) Force the row-tiled + single-row-halo path (production-shape regime).
    fwd_tiled = jax.jit(functools.partial(dwconv_forward, H=H, W=W,
                                          row_tile_bytes=1024))
    out_tiled = fwd_tiled(x, w=w, b=b)
    jax.block_until_ready(out_tiled)
    assert jnp.allclose(out_tiled, ref, atol=1e-4, rtol=1e-4), "mismatch (tiled path)"

    # 3) Trailing partial row tile: scale-1 image has 12 rows, TH=8 -> 8 + 4.
    H2, W2 = 6, 8
    n2 = (H2 * W2) // 4
    x2 = jax.random.normal(kx, (B, 21 * n2, C), dtype=jnp.float32)
    ref2 = _reference_dwconv_forward(x2, H2, W2, w, b)
    out2 = jax.jit(functools.partial(dwconv_forward, H=H2, W=W2,
                                     row_tile_bytes=1024))(x2, w=w, b=b)
    jax.block_until_ready(out2)
    assert jnp.allclose(out2, ref2, atol=1e-4, rtol=1e-4), "mismatch (partial tile)"

    # 4) B == 1: rows are force-split so the grid has >= 2 parallel steps.
    x1 = x[:1]
    ref1 = _reference_dwconv_forward(x1, H, W, w, b)
    out1 = jax.jit(functools.partial(dwconv_forward, H=H, W=W))(x1, w=w, b=b)
    jax.block_until_ready(out1)
    assert jnp.allclose(out1, ref1, atol=1e-4, rtol=1e-4), "mismatch (B=1 split)"

    # 5) bf16 activations in HBM: bf16 tap multiplies, f32 accumulation.
    out_bf16 = fwd(x.astype(jnp.bfloat16), w=w, b=b)
    jax.block_until_ready(out_bf16)
    assert out_bf16.dtype == jnp.bfloat16
    assert jnp.allclose(out_bf16.astype(jnp.float32), ref, atol=5e-2, rtol=5e-2), \
        "mismatch (bf16 path)"

    print("KERNEL_OK")
</pallas_src>

<mosaic_0001>
module attributes {stable_mosaic.version = 11 : i64} {
  func.func @kernel(%arg0: i32, %arg1: i32, %arg2: memref<1x16x512xf32, #tpu.memory_space<vmem>>, %arg3: memref<3x3x512xf32, #tpu.memory_space<vmem>>, %arg4: memref<1x512xf32, #tpu.memory_space<vmem>>, %arg5: memref<1x16x512xf32, #tpu.memory_space<vmem>>) attributes {dimension_semantics = [#tpu.dimension_semantics<parallel>, #tpu.dimension_semantics<parallel>], iteration_bounds = array<i64: 2, 1>, scalar_prefetch = 0 : i64, scratch_operands = 0 : i64, tpu.core_type = #tpu.core_type<tc>, window_params = [{transform_indices = @transform_0, window_bounds = array<i64: 1, 16, 512>}, {pipeline_mode = #tpu.pipeline_mode<synchronous>, transform_indices = @transform_1, window_bounds = array<i64: 3, 3, 512>}, {pipeline_mode = #tpu.pipeline_mode<synchronous>, transform_indices = @transform_2, window_bounds = array<i64: 1, 512>}, {transform_indices = @transform_3, window_bounds = array<i64: 1, 16, 512>}]} {
    %c0 = arith.constant 0 : index
    %c0_0 = arith.constant 0 : index
    %c0_1 = arith.constant 0 : index
    %0 = vector.load %arg2[%c0, %c0_0, %c0_1] : memref<1x16x512xf32, #tpu.memory_space<vmem>>, vector<1x16x512xf32>
    %1 = vector.shape_cast %0 : vector<1x16x512xf32> to vector<16x512xf32>
    %cst = arith.constant 0.000000e+00 : f32
    %2 = vector.broadcast %cst : f32 to vector<1x512xf32>
    %3 = vector.extract_strided_slice %1 {offsets = [0, 0], sizes = [15, 512], strides = [1, 1]} : vector<16x512xf32> to vector<15x512xf32>
    %4 = tpu.concatenate %2, %3 in 0 : vector<1x512xf32>, vector<15x512xf32> -> vector<16x512xf32>
    %5 = vector.extract_strided_slice %1 {offsets = [1, 0], sizes = [15, 512], strides = [1, 1]} : vector<16x512xf32> to vector<15x512xf32>
    %6 = tpu.concatenate %5, %2 in 0 : vector<15x512xf32>, vector<1x512xf32> -> vector<16x512xf32>
    %cst_2 = arith.constant 0.000000e+00 : f32
    %7 = vector.broadcast %cst_2 : f32 to vector<16x32xf32>
    %c0_3 = arith.constant 0 : index
    %c0_4 = arith.constant 0 : index
    %c0_5 = arith.constant 0 : index
    %8 = vector.load %arg3[%c0_3, %c0_4, %c0_5] : memref<3x3x512xf32, #tpu.memory_space<vmem>>, vector<3x3x512xf32>
    %cst_6 = arith.constant 0.000000e+00 : f32
    %9 = vector.broadcast %cst_6 : f32 to vector<16x512xf32>
    %10 = vector.extract_strided_slice %4 {offsets = [0, 0], sizes = [16, 480], strides = [1, 1]} : vector<16x512xf32> to vector<16x480xf32>
    %11 = tpu.concatenate %7, %10 in 1 : vector<16x32xf32>, vector<16x480xf32> -> vector<16x512xf32>
    %12 = vector.extract_strided_slice %8 {offsets = [0, 0, 0], sizes = [1, 1, 512], strides = [1, 1, 1]} : vector<3x3x512xf32> to vector<1x1x512xf32>
    %13 = vector.shape_cast %12 : vector<1x1x512xf32> to vector<512xf32>
    %14 = vector.shape_cast %13 : vector<512xf32> to vector<1x512xf32>
    %15 = vector.broadcast %14 : vector<1x512xf32> to vector<16x512xf32>
    %16 = arith.mulf %11, %15 : vector<16x512xf32>
    %17 = arith.addf %9, %16 : vector<16x512xf32>
    %18 = vector.extract_strided_slice %8 {offsets = [0, 1, 0], sizes = [1, 1, 512], strides = [1, 1, 1]} : vector<3x3x512xf32> to vector<1x1x512xf32>
    %19 = vector.shape_cast %18 : vector<1x1x512xf32> to vector<512xf32>
    %20 = vector.shape_cast %19 : vector<512xf32> to vector<1x512xf32>
    %21 = vector.broadcast %20 : vector<1x512xf32> to vector<16x512xf32>
    %22 = arith.mulf %4, %21 : vector<16x512xf32>
    %23 = arith.addf %17, %22 : vector<16x512xf32>
    %24 = vector.extract_strided_slice %4 {offsets = [0, 32], sizes = [16, 480], strides = [1, 1]} : vector<16x512xf32> to vector<16x480xf32>
    %25 = tpu.concatenate %24, %7 in 1 : vector<16x480xf32>, vector<16x32xf32> -> vector<16x512xf32>
    %26 = vector.extract_strided_slice %8 {offsets = [0, 2, 0], sizes = [1, 1, 512], strides = [1, 1, 1]} : vector<3x3x512xf32> to vector<1x1x512xf32>
    %27 = vector.shape_cast %26 : vector<1x1x512xf32> to vector<512xf32>
    %28 = vector.shape_cast %27 : vector<512xf32> to vector<1x512xf32>
    %29 = vector.broadcast %28 : vector<1x512xf32> to vector<16x512xf32>
    %30 = arith.mulf %25, %29 : vector<16x512xf32>
    %31 = arith.addf %23, %30 : vector<16x512xf32>
    %32 = vector.extract_strided_slice %1 {offsets = [0, 0], sizes = [16, 480], strides = [1, 1]} : vector<16x512xf32> to vector<16x480xf32>
    %33 = tpu.concatenate %7, %32 in 1 : vector<16x32xf32>, vector<16x480xf32> -> vector<16x512xf32>
    %34 = vector.extract_strided_slice %8 {offsets = [1, 0, 0], sizes = [1, 1, 512], strides = [1, 1, 1]} : vector<3x3x512xf32> to vector<1x1x512xf32>
    %35 = vector.shape_cast %34 : vector<1x1x512xf32> to vector<512xf32>
    %36 = vector.shape_cast %35 : vector<512xf32> to vector<1x512xf32>
    %37 = vector.broadcast %36 : vector<1x512xf32> to vector<16x512xf32>
    %38 = arith.mulf %33, %37 : vector<16x512xf32>
    %39 = arith.addf %31, %38 : vector<16x512xf32>
    %40 = vector.extract_strided_slice %8 {offsets = [1, 1, 0], sizes = [1, 1, 512], strides = [1, 1, 1]} : vector<3x3x512xf32> to vector<1x1x512xf32>
    %41 = vector.shape_cast %40 : vector<1x1x512xf32> to vector<512xf32>
    %42 = vector.shape_cast %41 : vector<512xf32> to vector<1x512xf32>
    %43 = vector.broadcast %42 : vector<1x512xf32> to vector<16x512xf32>
    %44 = arith.mulf %1, %43 : vector<16x512xf32>
    %45 = arith.addf %39, %44 : vector<16x512xf32>
    %46 = vector.extract_strided_slice %1 {offsets = [0, 32], sizes = [16, 480], strides = [1, 1]} : vector<16x512xf32> to vector<16x480xf32>
    %47 = tpu.concatenate %46, %7 in 1 : vector<16x480xf32>, vector<16x32xf32> -> vector<16x512xf32>
    %48 = vector.extract_strided_slice %8 {offsets = [1, 2, 0], sizes = [1, 1, 512], strides = [1, 1, 1]} : vector<3x3x512xf32> to vector<1x1x512xf32>
    %49 = vector.shape_cast %48 : vector<1x1x512xf32> to vector<512xf32>
    %50 = vector.shape_cast %49 : vector<512xf32> to vector<1x512xf32>
    %51 = vector.broadcast %50 : vector<1x512xf32> to vector<16x512xf32>
    %52 = arith.mulf %47, %51 : vector<16x512xf32>
    %53 = arith.addf %45, %52 : vector<16x512xf32>
    %54 = vector.extract_strided_slice %6 {offsets = [0, 0], sizes = [16, 480], strides = [1, 1]} : vector<16x512xf32> to vector<16x480xf32>
    %55 = tpu.concatenate %7, %54 in 1 : vector<16x32xf32>, vector<16x480xf32> -> vector<16x512xf32>
    %56 = vector.extract_strided_slice %8 {offsets = [2, 0, 0], sizes = [1, 1, 512], strides = [1, 1, 1]} : vector<3x3x512xf32> to vector<1x1x512xf32>
    %57 = vector.shape_cast %56 : vector<1x1x512xf32> to vector<512xf32>
    %58 = vector.shape_cast %57 : vector<512xf32> to vector<1x512xf32>
    %59 = vector.broadcast %58 : vector<1x512xf32> to vector<16x512xf32>
    %60 = arith.mulf %55, %59 : vector<16x512xf32>
    %61 = arith.addf %53, %60 : vector<16x512xf32>
    %62 = vector.extract_strided_slice %8 {offsets = [2, 1, 0], sizes = [1, 1, 512], strides = [1, 1, 1]} : vector<3x3x512xf32> to vector<1x1x512xf32>
    %63 = vector.shape_cast %62 : vector<1x1x512xf32> to vector<512xf32>
    %64 = vector.shape_cast %63 : vector<512xf32> to vector<1x512xf32>
    %65 = vector.broadcast %64 : vector<1x512xf32> to vector<16x512xf32>
    %66 = arith.mulf %6, %65 : vector<16x512xf32>
    %67 = arith.addf %61, %66 : vector<16x512xf32>
    %68 = vector.extract_strided_slice %6 {offsets = [0, 32], sizes = [16, 480], strides = [1, 1]} : vector<16x512xf32> to vector<16x480xf32>
    %69 = tpu.concatenate %68, %7 in 1 : vector<16x480xf32>, vector<16x32xf32> -> vector<16x512xf32>
    %70 = vector.extract_strided_slice %8 {offsets = [2, 2, 0], sizes = [1, 1, 512], strides = [1, 1, 1]} : vector<3x3x512xf32> to vector<1x1x512xf32>
    %71 = vector.shape_cast %70 : vector<1x1x512xf32> to vector<512xf32>
    %72 = vector.shape_cast %71 : vector<512xf32> to vector<1x512xf32>
    %73 = vector.broadcast %72 : vector<1x512xf32> to vector<16x512xf32>
    %74 = arith.mulf %69, %73 : vector<16x512xf32>
    %75 = arith.addf %67, %74 : vector<16x512xf32>
    %c0_7 = arith.constant 0 : index
    %c0_8 = arith.constant 0 : index
    %76 = vector.load %arg4[%c0_7, %c0_8] : memref<1x512xf32, #tpu.memory_space<vmem>>, vector<1x512xf32>
    %77 = vector.broadcast %76 : vector<1x512xf32> to vector<16x512xf32>
    %78 = arith.addf %75, %77 : vector<16x512xf32>
    %c0_9 = arith.constant 0 : index
    %c0_10 = arith.constant 0 : index
    %c0_11 = arith.constant 0 : index
    %79 = vector.load %arg5[%c0_9, %c0_10, %c0_11] : memref<1x16x512xf32, #tpu.memory_space<vmem>>, vector<1x16x512xf32>
    %80 = vector.shape_cast %79 : vector<1x16x512xf32> to vector<16x512xf32>
    %81 = vector.shape_cast %78 : vector<16x512xf32> to vector<1x16x512xf32>
    tpu.vector_store %arg5[%c0_9, %c0_10, %c0_11], %81 {strides = array<i32>} : memref<1x16x512xf32, #tpu.memory_space<vmem>>, vector<1x16x512xf32>,
    return
  }
  func.func @transform_0(%arg0: i32, %arg1: i32) -> (i32, i32, i32) {
    %c0_i32 = arith.constant 0 : i32
    %c0_i32_0 = arith.constant 0 : i32
    return %arg0, %arg1, %c0_i32 : i32, i32, i32
  }
  func.func @transform_1(%arg0: i32, %arg1: i32) -> (i32, i32, i32) {
    %c0_i32 = arith.constant 0 : i32
    %c0_i32_0 = arith.constant 0 : i32
    %c0_i32_1 = arith.constant 0 : i32
    %c0_i32_2 = arith.constant 0 : i32
    return %c0_i32, %c0_i32_0, %c0_i32_1 : i32, i32, i32
  }
  func.func @transform_2(%arg0: i32, %arg1: i32) -> (i32, i32) {
    %c0_i32 = arith.constant 0 : i32
    %c0_i32_0 = arith.constant 0 : i32
    %c0_i32_1 = arith.constant 0 : i32
    return %c0_i32, %c0_i32_0 : i32, i32
  }
  func.func @transform_3(%arg0: i32, %arg1: i32) -> (i32, i32, i32) {
    %c0_i32 = arith.constant 0 : i32
    %c0_i32_0 = arith.constant 0 : i32
    return %arg0, %arg1, %c0_i32 : i32, i32, i32
  }
}

module attributes {stable_mosaic.version = 11 : i64} {
  func.func @kernel(%arg0: i32, %arg1: i32, %arg2: memref<1x8x256xf32, #tpu.memory_space<vmem>>, %arg3: memref<3x3x256xf32, #tpu.memory_space<vmem>>, %arg4: memref<1x256xf32, #tpu.memory_space<vmem>>, %arg5: memref<1x8x256xf32, #tpu.memory_space<vmem>>) attributes {dimension_semantics = [#tpu.dimension_semantics<parallel>, #tpu.dimension_semantics<parallel>], iteration_bounds = array<i64: 2, 1>, scalar_prefetch = 0 : i64, scratch_operands = 0 : i64, tpu.core_type = #tpu.core_type<tc>, window_params = [{transform_indices = @transform_0, window_bounds = array<i64: 1, 8, 256>}, {pipeline_mode = #tpu.pipeline_mode<synchronous>, transform_indices = @transform_1, window_bounds = array<i64: 3, 3, 256>}, {pipeline_mode = #tpu.pipeline_mode<synchronous>, transform_indices = @transform_2, window_bounds = array<i64: 1, 256>}, {transform_indices = @transform_3, window_bounds = array<i64: 1, 8, 256>}]} {
    %c0 = arith.constant 0 : index
    %c0_0 = arith.constant 0 : index
    %c0_1 = arith.constant 0 : index
    %0 = vector.load %arg2[%c0, %c0_0, %c0_1] : memref<1x8x256xf32, #tpu.memory_space<vmem>>, vector<1x8x256xf32>
    %1 = vector.shape_cast %0 : vector<1x8x256xf32> to vector<8x256xf32>
    %cst = arith.constant 0.000000e+00 : f32
    %2 = vector.broadcast %cst : f32 to vector<1x256xf32>
    %3 = vector.extract_strided_slice %1 {offsets = [0, 0], sizes = [7, 256], strides = [1, 1]} : vector<8x256xf32> to vector<7x256xf32>
    %4 = tpu.concatenate %2, %3 in 0 : vector<1x256xf32>, vector<7x256xf32> -> vector<8x256xf32>
    %5 = vector.extract_strided_slice %1 {offsets = [1, 0], sizes = [7, 256], strides = [1, 1]} : vector<8x256xf32> to vector<7x256xf32>
    %6 = tpu.concatenate %5, %2 in 0 : vector<7x256xf32>, vector<1x256xf32> -> vector<8x256xf32>
    %cst_2 = arith.constant 0.000000e+00 : f32
    %7 = vector.broadcast %cst_2 : f32 to vector<8x32xf32>
    %c0_3 = arith.constant 0 : index
    %c0_4 = arith.constant 0 : index
    %c0_5 = arith.constant 0 : index
    %8 = vector.load %arg3[%c0_3, %c0_4, %c0_5] : memref<3x3x256xf32, #tpu.memory_space<vmem>>, vector<3x3x256xf32>
    %cst_6 = arith.constant 0.000000e+00 : f32
    %9 = vector.broadcast %cst_6 : f32 to vector<8x256xf32>
    %10 = vector.extract_strided_slice %4 {offsets = [0, 0], sizes = [8, 224], strides = [1, 1]} : vector<8x256xf32> to vector<8x224xf32>
    %11 = tpu.concatenate %7, %10 in 1 : vector<8x32xf32>, vector<8x224xf32> -> vector<8x256xf32>
    %12 = vector.extract_strided_slice %8 {offsets = [0, 0, 0], sizes = [1, 1, 256], strides = [1, 1, 1]} : vector<3x3x256xf32> to vector<1x1x256xf32>
    %13 = vector.shape_cast %12 : vector<1x1x256xf32> to vector<256xf32>
    %14 = vector.shape_cast %13 : vector<256xf32> to vector<1x256xf32>
    %15 = vector.broadcast %14 : vector<1x256xf32> to vector<8x256xf32>
    %16 = arith.mulf %11, %15 : vector<8x256xf32>
    %17 = arith.addf %9, %16 : vector<8x256xf32>
    %18 = vector.extract_strided_slice %8 {offsets = [0, 1, 0], sizes = [1, 1, 256], strides = [1, 1, 1]} : vector<3x3x256xf32> to vector<1x1x256xf32>
    %19 = vector.shape_cast %18 : vector<1x1x256xf32> to vector<256xf32>
    %20 = vector.shape_cast %19 : vector<256xf32> to vector<1x256xf32>
    %21 = vector.broadcast %20 : vector<1x256xf32> to vector<8x256xf32>
    %22 = arith.mulf %4, %21 : vector<8x256xf32>
    %23 = arith.addf %17, %22 : vector<8x256xf32>
    %24 = vector.extract_strided_slice %4 {offsets = [0, 32], sizes = [8, 224], strides = [1, 1]} : vector<8x256xf32> to vector<8x224xf32>
    %25 = tpu.concatenate %24, %7 in 1 : vector<8x224xf32>, vector<8x32xf32> -> vector<8x256xf32>
    %26 = vector.extract_strided_slice %8 {offsets = [0, 2, 0], sizes = [1, 1, 256], strides = [1, 1, 1]} : vector<3x3x256xf32> to vector<1x1x256xf32>
    %27 = vector.shape_cast %26 : vector<1x1x256xf32> to vector<256xf32>
    %28 = vector.shape_cast %27 : vector<256xf32> to vector<1x256xf32>
    %29 = vector.broadcast %28 : vector<1x256xf32> to vector<8x256xf32>
    %30 = arith.mulf %25, %29 : vector<8x256xf32>
    %31 = arith.addf %23, %30 : vector<8x256xf32>
    %32 = vector.extract_strided_slice %1 {offsets = [0, 0], sizes = [8, 224], strides = [1, 1]} : vector<8x256xf32> to vector<8x224xf32>
    %33 = tpu.concatenate %7, %32 in 1 : vector<8x32xf32>, vector<8x224xf32> -> vector<8x256xf32>
    %34 = vector.extract_strided_slice %8 {offsets = [1, 0, 0], sizes = [1, 1, 256], strides = [1, 1, 1]} : vector<3x3x256xf32> to vector<1x1x256xf32>
    %35 = vector.shape_cast %34 : vector<1x1x256xf32> to vector<256xf32>
    %36 = vector.shape_cast %35 : vector<256xf32> to vector<1x256xf32>
    %37 = vector.broadcast %36 : vector<1x256xf32> to vector<8x256xf32>
    %38 = arith.mulf %33, %37 : vector<8x256xf32>
    %39 = arith.addf %31, %38 : vector<8x256xf32>
    %40 = vector.extract_strided_slice %8 {offsets = [1, 1, 0], sizes = [1, 1, 256], strides = [1, 1, 1]} : vector<3x3x256xf32> to vector<1x1x256xf32>
    %41 = vector.shape_cast %40 : vector<1x1x256xf32> to vector<256xf32>
    %42 = vector.shape_cast %41 : vector<256xf32> to vector<1x256xf32>
    %43 = vector.broadcast %42 : vector<1x256xf32> to vector<8x256xf32>
    %44 = arith.mulf %1, %43 : vector<8x256xf32>
    %45 = arith.addf %39, %44 : vector<8x256xf32>
    %46 = vector.extract_strided_slice %1 {offsets = [0, 32], sizes = [8, 224], strides = [1, 1]} : vector<8x256xf32> to vector<8x224xf32>
    %47 = tpu.concatenate %46, %7 in 1 : vector<8x224xf32>, vector<8x32xf32> -> vector<8x256xf32>
    %48 = vector.extract_strided_slice %8 {offsets = [1, 2, 0], sizes = [1, 1, 256], strides = [1, 1, 1]} : vector<3x3x256xf32> to vector<1x1x256xf32>
    %49 = vector.shape_cast %48 : vector<1x1x256xf32> to vector<256xf32>
    %50 = vector.shape_cast %49 : vector<256xf32> to vector<1x256xf32>
    %51 = vector.broadcast %50 : vector<1x256xf32> to vector<8x256xf32>
    %52 = arith.mulf %47, %51 : vector<8x256xf32>
    %53 = arith.addf %45, %52 : vector<8x256xf32>
    %54 = vector.extract_strided_slice %6 {offsets = [0, 0], sizes = [8, 224], strides = [1, 1]} : vector<8x256xf32> to vector<8x224xf32>
    %55 = tpu.concatenate %7, %54 in 1 : vector<8x32xf32>, vector<8x224xf32> -> vector<8x256xf32>
    %56 = vector.extract_strided_slice %8 {offsets = [2, 0, 0], sizes = [1, 1, 256], strides = [1, 1, 1]} : vector<3x3x256xf32> to vector<1x1x256xf32>
    %57 = vector.shape_cast %56 : vector<1x1x256xf32> to vector<256xf32>
    %58 = vector.shape_cast %57 : vector<256xf32> to vector<1x256xf32>
    %59 = vector.broadcast %58 : vector<1x256xf32> to vector<8x256xf32>
    %60 = arith.mulf %55, %59 : vector<8x256xf32>
    %61 = arith.addf %53, %60 : vector<8x256xf32>
    %62 = vector.extract_strided_slice %8 {offsets = [2, 1, 0], sizes = [1, 1, 256], strides = [1, 1, 1]} : vector<3x3x256xf32> to vector<1x1x256xf32>
    %63 = vector.shape_cast %62 : vector<1x1x256xf32> to vector<256xf32>
    %64 = vector.shape_cast %63 : vector<256xf32> to vector<1x256xf32>
    %65 = vector.broadcast %64 : vector<1x256xf32> to vector<8x256xf32>
    %66 = arith.mulf %6, %65 : vector<8x256xf32>
    %67 = arith.addf %61, %66 : vector<8x256xf32>
    %68 = vector.extract_strided_slice %6 {offsets = [0, 32], sizes = [8, 224], strides = [1, 1]} : vector<8x256xf32> to vector<8x224xf32>
    %69 = tpu.concatenate %68, %7 in 1 : vector<8x224xf32>, vector<8x32xf32> -> vector<8x256xf32>
    %70 = vector.extract_strided_slice %8 {offsets = [2, 2, 0], sizes = [1, 1, 256], strides = [1, 1, 1]} : vector<3x3x256xf32> to vector<1x1x256xf32>
    %71 = vector.shape_cast %70 : vector<1x1x256xf32> to vector<256xf32>
    %72 = vector.shape_cast %71 : vector<256xf32> to vector<1x256xf32>
    %73 = vector.broadcast %72 : vector<1x256xf32> to vector<8x256xf32>
    %74 = arith.mulf %69, %73 : vector<8x256xf32>
    %75 = arith.addf %67, %74 : vector<8x256xf32>
    %c0_7 = arith.constant 0 : index
    %c0_8 = arith.constant 0 : index
    %76 = vector.load %arg4[%c0_7, %c0_8] : memref<1x256xf32, #tpu.memory_space<vmem>>, vector<1x256xf32>
    %77 = vector.broadcast %76 : vector<1x256xf32> to vector<8x256xf32>
    %78 = arith.addf %75, %77 : vector<8x256xf32>
    %c0_9 = arith.constant 0 : index
    %c0_10 = arith.constant 0 : index
    %c0_11 = arith.constant 0 : index
    %79 = vector.load %arg5[%c0_9, %c0_10, %c0_11] : memref<1x8x256xf32, #tpu.memory_space<vmem>>, vector<1x8x256xf32>
    %80 = vector.shape_cast %79 : vector<1x8x256xf32> to vector<8x256xf32>
    %81 = vector.shape_cast %78 : vector<8x256xf32> to vector<1x8x256xf32>
    tpu.vector_store %arg5[%c0_9, %c0_10, %c0_11], %81 {strides = array<i32>} : memref<1x8x256xf32, #tpu.memory_space<vmem>>, vector<1x8x256xf32>,
    return
  }
  func.func @transform_0(%arg0: i32, %arg1: i32) -> (i32, i32, i32) {
    %c0_i32 = arith.constant 0 : i32
    %c0_i32_0 = arith.constant 0 : i32
    return %arg0, %arg1, %c0_i32 : i32, i32, i32
  }
  func.func @transform_1(%arg0: i32, %arg1: i32) -> (i32, i32, i32) {
    %c0_i32 = arith.constant 0 : i32
    %c0_i32_0 = arith.constant 0 : i32
    %c0_i32_1 = arith.constant 0 : i32
    %c0_i32_2 = arith.constant 0 : i32
    return %c0_i32, %c0_i32_0, %c0_i32_1 : i32, i32, i32
  }
  func.func @transform_2(%arg0: i32, %arg1: i32) -> (i32, i32) {
    %c0_i32 = arith.constant 0 : i32
    %c0_i32_0 = arith.constant 0 : i32
    %c0_i32_1 = arith.constant 0 : i32
    return %c0_i32, %c0_i32_0 : i32, i32
  }
  func.func @transform_3(%arg0: i32, %arg1: i32) -> (i32, i32, i32) {
    %c0_i32 = arith.constant 0 : i32
    %c0_i32_0 = arith.constant 0 : i32
    return %arg0, %arg1, %c0_i32 : i32, i32, i32
  }
}

module attributes {stable_mosaic.version = 11 : i64} {
  func.func @kernel(%arg0: i32, %arg1: i32, %arg2: memref<1x4x128xf32, #tpu.memory_space<vmem>>, %arg3: memref<3x3x128xf32, #tpu.memory_space<vmem>>, %arg4: memref<1x128xf32, #tpu.memory_space<vmem>>, %arg5: memref<1x4x128xf32, #tpu.memory_space<vmem>>) attributes {dimension_semantics = [#tpu.dimension_semantics<parallel>, #tpu.dimension_semantics<parallel>], iteration_bounds = array<i64: 2, 1>, scalar_prefetch = 0 : i64, scratch_operands = 0 : i64, tpu.core_type = #tpu.core_type<tc>, window_params = [{transform_indices = @transform_0, window_bounds = array<i64: 1, 4, 128>}, {pipeline_mode = #tpu.pipeline_mode<synchronous>, transform_indices = @transform_1, window_bounds = array<i64: 3, 3, 128>}, {pipeline_mode = #tpu.pipeline_mode<synchronous>, transform_indices = @transform_2, window_bounds = array<i64: 1, 128>}, {transform_indices = @transform_3, window_bounds = array<i64: 1, 4, 128>}]} {
    %c0 = arith.constant 0 : index
    %c0_0 = arith.constant 0 : index
    %c0_1 = arith.constant 0 : index
    %0 = vector.load %arg2[%c0, %c0_0, %c0_1] : memref<1x4x128xf32, #tpu.memory_space<vmem>>, vector<1x4x128xf32>
    %1 = vector.shape_cast %0 : vector<1x4x128xf32> to vector<4x128xf32>
    %cst = arith.constant 0.000000e+00 : f32
    %2 = vector.broadcast %cst : f32 to vector<1x128xf32>
    %3 = vector.extract_strided_slice %1 {offsets = [0, 0], sizes = [3, 128], strides = [1, 1]} : vector<4x128xf32> to vector<3x128xf32>
    %4 = tpu.concatenate %2, %3 in 0 : vector<1x128xf32>, vector<3x128xf32> -> vector<4x128xf32>
    %5 = vector.extract_strided_slice %1 {offsets = [1, 0], sizes = [3, 128], strides = [1, 1]} : vector<4x128xf32> to vector<3x128xf32>
    %6 = tpu.concatenate %5, %2 in 0 : vector<3x128xf32>, vector<1x128xf32> -> vector<4x128xf32>
    %cst_2 = arith.constant 0.000000e+00 : f32
    %7 = vector.broadcast %cst_2 : f32 to vector<4x32xf32>
    %c0_3 = arith.constant 0 : index
    %c0_4 = arith.constant 0 : index
    %c0_5 = arith.constant 0 : index
    %8 = vector.load %arg3[%c0_3, %c0_4, %c0_5] : memref<3x3x128xf32, #tpu.memory_space<vmem>>, vector<3x3x128xf32>
    %cst_6 = arith.constant 0.000000e+00 : f32
    %9 = vector.broadcast %cst_6 : f32 to vector<4x128xf32>
    %10 = vector.extract_strided_slice %4 {offsets = [0, 0], sizes = [4, 96], strides = [1, 1]} : vector<4x128xf32> to vector<4x96xf32>
    %11 = tpu.concatenate %7, %10 in 1 : vector<4x32xf32>, vector<4x96xf32> -> vector<4x128xf32>
    %12 = vector.extract_strided_slice %8 {offsets = [0, 0, 0], sizes = [1, 1, 128], strides = [1, 1, 1]} : vector<3x3x128xf32> to vector<1x1x128xf32>
    %13 = vector.shape_cast %12 : vector<1x1x128xf32> to vector<128xf32>
    %14 = vector.shape_cast %13 : vector<128xf32> to vector<1x128xf32>
    %15 = vector.broadcast %14 : vector<1x128xf32> to vector<4x128xf32>
    %16 = arith.mulf %11, %15 : vector<4x128xf32>
    %17 = arith.addf %9, %16 : vector<4x128xf32>
    %18 = vector.extract_strided_slice %8 {offsets = [0, 1, 0], sizes = [1, 1, 128], strides = [1, 1, 1]} : vector<3x3x128xf32> to vector<1x1x128xf32>
    %19 = vector.shape_cast %18 : vector<1x1x128xf32> to vector<128xf32>
    %20 = vector.shape_cast %19 : vector<128xf32> to vector<1x128xf32>
    %21 = vector.broadcast %20 : vector<1x128xf32> to vector<4x128xf32>
    %22 = arith.mulf %4, %21 : vector<4x128xf32>
    %23 = arith.addf %17, %22 : vector<4x128xf32>
    %24 = vector.extract_strided_slice %4 {offsets = [0, 32], sizes = [4, 96], strides = [1, 1]} : vector<4x128xf32> to vector<4x96xf32>
    %25 = tpu.concatenate %24, %7 in 1 : vector<4x96xf32>, vector<4x32xf32> -> vector<4x128xf32>
    %26 = vector.extract_strided_slice %8 {offsets = [0, 2, 0], sizes = [1, 1, 128], strides = [1, 1, 1]} : vector<3x3x128xf32> to vector<1x1x128xf32>
    %27 = vector.shape_cast %26 : vector<1x1x128xf32> to vector<128xf32>
    %28 = vector.shape_cast %27 : vector<128xf32> to vector<1x128xf32>
    %29 = vector.broadcast %28 : vector<1x128xf32> to vector<4x128xf32>
    %30 = arith.mulf %25, %29 : vector<4x128xf32>
    %31 = arith.addf %23, %30 : vector<4x128xf32>
    %32 = vector.extract_strided_slice %1 {offsets = [0, 0], sizes = [4, 96], strides = [1, 1]} : vector<4x128xf32> to vector<4x96xf32>
    %33 = tpu.concatenate %7, %32 in 1 : vector<4x32xf32>, vector<4x96xf32> -> vector<4x128xf32>
    %34 = vector.extract_strided_slice %8 {offsets = [1, 0, 0], sizes = [1, 1, 128], strides = [1, 1, 1]} : vector<3x3x128xf32> to vector<1x1x128xf32>
    %35 = vector.shape_cast %34 : vector<1x1x128xf32> to vector<128xf32>
    %36 = vector.shape_cast %35 : vector<128xf32> to vector<1x128xf32>
    %37 = vector.broadcast %36 : vector<1x128xf32> to vector<4x128xf32>
    %38 = arith.mulf %33, %37 : vector<4x128xf32>
    %39 = arith.addf %31, %38 : vector<4x128xf32>
    %40 = vector.extract_strided_slice %8 {offsets = [1, 1, 0], sizes = [1, 1, 128], strides = [1, 1, 1]} : vector<3x3x128xf32> to vector<1x1x128xf32>
    %41 = vector.shape_cast %40 : vector<1x1x128xf32> to vector<128xf32>
    %42 = vector.shape_cast %41 : vector<128xf32> to vector<1x128xf32>
    %43 = vector.broadcast %42 : vector<1x128xf32> to vector<4x128xf32>
    %44 = arith.mulf %1, %43 : vector<4x128xf32>
    %45 = arith.addf %39, %44 : vector<4x128xf32>
    %46 = vector.extract_strided_slice %1 {offsets = [0, 32], sizes = [4, 96], strides = [1, 1]} : vector<4x128xf32> to vector<4x96xf32>
    %47 = tpu.concatenate %46, %7 in 1 : vector<4x96xf32>, vector<4x32xf32> -> vector<4x128xf32>
    %48 = vector.extract_strided_slice %8 {offsets = [1, 2, 0], sizes = [1, 1, 128], strides = [1, 1, 1]} : vector<3x3x128xf32> to vector<1x1x128xf32>
    %49 = vector.shape_cast %48 : vector<1x1x128xf32> to vector<128xf32>
    %50 = vector.shape_cast %49 : vector<128xf32> to vector<1x128xf32>
    %51 = vector.broadcast %50 : vector<1x128xf32> to vector<4x128xf32>
    %52 = arith.mulf %47, %51 : vector<4x128xf32>
    %53 = arith.addf %45, %52 : vector<4x128xf32>
    %54 = vector.extract_strided_slice %6 {offsets = [0, 0], sizes = [4, 96], strides = [1, 1]} : vector<4x128xf32> to vector<4x96xf32>
    %55 = tpu.concatenate %7, %54 in 1 : vector<4x32xf32>, vector<4x96xf32> -> vector<4x128xf32>
    %56 = vector.extract_strided_slice %8 {offsets = [2, 0, 0], sizes = [1, 1, 128], strides = [1, 1, 1]} : vector<3x3x128xf32> to vector<1x1x128xf32>
    %57 = vector.shape_cast %56 : vector<1x1x128xf32> to vector<128xf32>
    %58 = vector.shape_cast %57 : vector<128xf32> to vector<1x128xf32>
    %59 = vector.broadcast %58 : vector<1x128xf32> to vector<4x128xf32>
    %60 = arith.mulf %55, %59 : vector<4x128xf32>
    %61 = arith.addf %53, %60 : vector<4x128xf32>
    %62 = vector.extract_strided_slice %8 {offsets = [2, 1, 0], sizes = [1, 1, 128], strides = [1, 1, 1]} : vector<3x3x128xf32> to vector<1x1x128xf32>
    %63 = vector.shape_cast %62 : vector<1x1x128xf32> to vector<128xf32>
    %64 = vector.shape_cast %63 : vector<128xf32> to vector<1x128xf32>
    %65 = vector.broadcast %64 : vector<1x128xf32> to vector<4x128xf32>
    %66 = arith.mulf %6, %65 : vector<4x128xf32>
    %67 = arith.addf %61, %66 : vector<4x128xf32>
    %68 = vector.extract_strided_slice %6 {offsets = [0, 32], sizes = [4, 96], strides = [1, 1]} : vector<4x128xf32> to vector<4x96xf32>
    %69 = tpu.concatenate %68, %7 in 1 : vector<4x96xf32>, vector<4x32xf32> -> vector<4x128xf32>
    %70 = vector.extract_strided_slice %8 {offsets = [2, 2, 0], sizes = [1, 1, 128], strides = [1, 1, 1]} : vector<3x3x128xf32> to vector<1x1x128xf32>
    %71 = vector.shape_cast %70 : vector<1x1x128xf32> to vector<128xf32>
    %72 = vector.shape_cast %71 : vector<128xf32> to vector<1x128xf32>
    %73 = vector.broadcast %72 : vector<1x128xf32> to vector<4x128xf32>
    %74 = arith.mulf %69, %73 : vector<4x128xf32>
    %75 = arith.addf %67, %74 : vector<4x128xf32>
    %c0_7 = arith.constant 0 : index
    %c0_8 = arith.constant 0 : index
    %76 = vector.load %arg4[%c0_7, %c0_8] : memref<1x128xf32, #tpu.memory_space<vmem>>, vector<1x128xf32>
    %77 = vector.broadcast %76 : vector<1x128xf32> to vector<4x128xf32>
    %78 = arith.addf %75, %77 : vector<4x128xf32>
    %c0_9 = arith.constant 0 : index
    %c0_10 = arith.constant 0 : index
    %c0_11 = arith.constant 0 : index
    %79 = vector.load %arg5[%c0_9, %c0_10, %c0_11] : memref<1x4x128xf32, #tpu.memory_space<vmem>>, vector<1x4x128xf32>
    %80 = vector.shape_cast %79 : vector<1x4x128xf32> to vector<4x128xf32>
    %81 = vector.shape_cast %78 : vector<4x128xf32> to vector<1x4x128xf32>
    tpu.vector_store %arg5[%c0_9, %c0_10, %c0_11], %81 {strides = array<i32>} : memref<1x4x128xf32, #tpu.memory_space<vmem>>, vector<1x4x128xf32>,
    return
  }
  func.func @transform_0(%arg0: i32, %arg1: i32) -> (i32, i32, i32) {
    %c0_i32 = arith.constant 0 : i32
    %c0_i32_0 = arith.constant 0 : i32
    return %arg0, %arg1, %c0_i32 : i32, i32, i32
  }
  func.func @transform_1(%arg0: i32, %arg1: i32) -> (i32, i32, i32) {
    %c0_i32 = arith.constant 0 : i32
    %c0_i32_0 = arith.constant 0 : i32
    %c0_i32_1 = arith.constant 0 : i32
    %c0_i32_2 = arith.constant 0 : i32
    return %c0_i32, %c0_i32_0, %c0_i32_1 : i32, i32, i32
  }
  func.func @transform_2(%arg0: i32, %arg1: i32) -> (i32, i32) {
    %c0_i32 = arith.constant 0 : i32
    %c0_i32_0 = arith.constant 0 : i32
    %c0_i32_1 = arith.constant 0 : i32
    return %c0_i32, %c0_i32_0 : i32, i32
  }
  func.func @transform_3(%arg0: i32, %arg1: i32) -> (i32, i32, i32) {
    %c0_i32 = arith.constant 0 : i32
    %c0_i32_0 = arith.constant 0 : i32
    return %arg0, %arg1, %c0_i32 : i32, i32, i32
  }
}

</mosaic_0001>

<bundles_post_ra>
// kernel: tile.34
= control target key start
LH: loop header
LB: loop body
LE: loop exit
PB: predicated region body
PF: predicated region fallthrough
CT: control target
= control target key end

     0   :  { %vm38_vm0 = vcmask 1043458   ;;  %vm43_vm1 = vcmask 1045508   ;;  %s86_s6 = smov 3  ;;  %vm48_vm2 = vcmask 1047558   ;;  %s89_s9 = smov 12  ;;  %vm3_vm3 = vcmask 261120   ;;  %s891_s0 = inlined_call_operand.vmem [shape: f32[3,3,16,32], index: 0, kind: input, shape index: {}]   ;;  %s892_s1 = inlined_call_operand.vmem [shape: f32[3,3,512], index: 1, kind: output, shape index: {}]  }
   0x1   :  { %v497_v0 = vld [vmem:[%s891_s0 + $0x63] ss:$16 sm:%s86_s6]   ;;  %s94_s10 = smov 48  ;;  %s99_s15 = smov 192  ;;  %v487_v15 = vld [vmem:[%s891_s0 + $0x60] ss:$4 sm:$0xff]  }
   0x2   :  { %v498_v1 = vld [vmem:[%s891_s0 + $0xbb] ss:$-28 sm:%s89_s9]   ;;  %s33_s16 = smov 3  ;;  %s36_s21 = smov 12  ;;  %v2_v22 = vld [vmem:[%s891_s0] ss:$4 sm:$0xff]  }
   0x3   :  { %v499_v2 = vld [vmem:[%s891_s0 + $0x37] ss:$16 sm:%s94_s10]   ;;  %v92_v3 = vsel %vm38_vm0, %v498_v1, %v497_v0  ;;  %v500_v4 = vld [vmem:[%s891_s0 + $0xb] ss:$16 sm:%s99_s15]   ;;  %s41_s22 = smov 48  ;;  %s46_s27 = smov 192 }
   0x4   :  { %v489_v5 = vld [vmem:[%s891_s0 + $0x3] ss:$16 sm:%s33_s16]   ;;  %v97_v6 = vsel %vm43_vm1, %v499_v2, %v92_v3  ;;  %v491_v8 = vld [vmem:[%s891_s0 - $0x29] ss:$16 sm:%s41_s22]   ;;  %s113_s28 = smov 3  ;;  %s116_s4 = smov 12 }
   0x5   :  { %v490_v7 = vld [vmem:[%s891_s0 + $0x5b] ss:$-28 sm:%s36_s21]   ;;  %v102_v9 = vsel %vm48_vm2, %v500_v4, %v97_v6  ;;  %s121_s5 = smov 48  ;;  %s557_s6 = smov 96   ;;  %v485_v28 = vld [vmem:[%s891_s0 + $0x20] ss:$4 sm:$0xff]  }
   0x6   :  { %v39_v10 = vsel %vm38_vm0, %v490_v7, %v489_v5  ;;  %v492_v11 = vld [vmem:[%s891_s0 - $0x55] ss:$16 sm:%s46_s27]   ;;  %103 = vrot.lane.b32.xlu1 %v102_v9, %s557_s6  ;;  %s126_s9 = smov 192  ;;  %s59_s10 = smov 3  ;;  %v486_v38 = vld [vmem:[%s891_s0 + $0x40] ss:$4 sm:$0xff]  }
   0x7   :  { %v501_v12 = vld [vmem:[%s891_s0 + $0x2b] ss:$-28 sm:%s113_s28]   ;;  %v44_v13 = vsel %vm43_vm1, %v491_v8, %v39_v10  ;;  %s62_s17 = smov 12  ;;  %s67_s18 = smov 48  ;;  %vm52_vm4 = vcmask 1048320   ;;  %vm176_vm5 = vcmask 785920  }
   0x8   :  { %v502_v14 = vld [vmem:[%s891_s0 - $0x1] ss:$16 sm:%s116_s4]   ;;  %v49_v16 = vsel %vm48_vm2, %v492_v11, %v44_v13  ;;  %24 = vst.msk [vmem:[#allocation0 + $0x40] ss:$8 sm:$0xf] %vm3_vm3, %v487_v15   ;;  %s72_s21 = smov 192 }
   0x9   :  { %v119_v17 = vsel %vm38_vm0, %v502_v14, %v501_v12  ;;  %v503_v18 = vld [vmem:[%s891_s0 + $0xcb] ss:$-28 sm:%s121_s5]   ;;  %26 = vst.msk [vmem:[#allocation0 + $0x21] ss:$8 sm:$0xf0] %vm3_vm3, %v487_v15   ;;  %50 = vrot.lane.b32.xlu0 %v49_v16, %s557_s6  ;;  %s157_s22 = smov 3 }
   0xa   :  { %v504_v19 = vld [vmem:[%s891_s0 - $0x11] ss:$16 sm:%s126_s9]   ;;  %v124_v20 = vsel %vm43_vm1, %v503_v18, %v119_v17  ;;  %v493_v21 = vld [vmem:[%s891_s0 + $0x33] ss:$16 sm:%s59_s10]   ;;  %s160_s29 = smov 12  ;;  %s165_s30 = smov 48 }
   0xb   :  { %v129_v23 = vsel %vm48_vm2, %v504_v19, %v124_v20  ;;  %v494_v24 = vld [vmem:[%s891_s0 + $0x8b] ss:$-28 sm:%s62_s17]   ;;  %4 = vst.msk [vmem:[#allocation0] ss:$8 sm:$0xf] %vm3_vm3, %v2_v22   ;;  %s170_s4 = smov 192 }
   0xc   :  { %v495_v25 = vld [vmem:[%s891_s0 + $0x7] ss:$16 sm:%s67_s18]   ;;  %6 = vst.msk [vmem:[#allocation0 - $0x1f] ss:$8 sm:$0xf0] %vm3_vm3, %v2_v22   ;;  %130 = vrot.lane.b32.xlu1 %v129_v23, %s557_s6  ;;  %v65_v26 = vsel %vm38_vm0, %v494_v24, %v493_v21  ;;  %s142_s12 = smov 3 }
   0xd   :  { %v496_v27 = vld [vmem:[%s891_s0 - $0x25] ss:$16 sm:%s72_s21]   ;;  %v70_v29 = vsel %vm43_vm1, %v495_v25, %v65_v26  ;;  %v507_v30 = vld [vmem:[%s891_s0 + $0x2] ss:$16 sm:%s157_s22]   ;;  %s145_s13 = smov 12  ;;  %s210_s18 = smov 3 }
   0xe   :  { %v508_v31 = vld [vmem:[%s891_s0 + $0x5a] ss:$-28 sm:%s160_s29]   ;;  %11 = vst.msk [vmem:[#allocation0 + $0x2] ss:$8 sm:$0xf] %vm3_vm3, %v485_v28   ;;  %v75_v32 = vsel %vm48_vm2, %v496_v27, %v70_v29  ;;  %s213_s19 = smov 12 }
   0xf   :  { %12 = vst.msk [vmem:[#allocation0] ss:$8 sm:$0xf0] %vm3_vm3, %v485_v28   ;;  %v163_v33 = vsel %vm38_vm0, %v508_v31, %v507_v30  ;;  %v509_v34 = vld [vmem:[%s891_s0 - $0x2a] ss:$16 sm:%s165_s30]   ;;  %76 = vrot.lane.b32.xlu0 %v75_v32, %s557_s6  ;;  %s218_s22 = smov 48 }
  0x10   :  { %v510_v35 = vld [vmem:[%s891_s0 - $0x56] ss:$16 sm:%s170_s4]   ;;  %v168_v36 = vsel %vm43_vm1, %v509_v34, %v163_v33  ;;  %v505_v37 = vld [vmem:[%s891_s0 + $0x8b] ss:$-28 sm:%s142_s12]   ;;  %s223_s23 = smov 192  ;;  %s183_s30 = smov 3 }
  0x11   :  { %v173_v39 = vsel %vm48_vm2, %v510_v35, %v168_v36  ;;  %v506_v40 = vld [vmem:[%s891_s0 + $0x5f] ss:$16 sm:%s145_s13]   ;;  %v515_v41 = vld [vmem:[%s891_s0 + $0x62] ss:$16 sm:%s210_s18]   ;;  %s558_s2 = smov 64   ;;  %s186_s5 = smov 12 }
  0x12   :  { %17 = vst.msk [vmem:[#allocation0 + $0x21] ss:$8 sm:$0xf] %vm3_vm3, %v486_v38   ;;  %19 = vst.msk [vmem:[#allocation0 + $0x2] ss:$8 sm:$0xf0] %vm3_vm3, %v486_v38   ;;  %174 = vrot.lane.b32.xlu1 %v173_v39, %s558_s2  ;;  %v148_v42 = vsel %vm38_vm0, %v506_v40, %v505_v37 }
  0x13   :  { %v516_v43 = vld [vmem:[%s891_s0 + $0xba] ss:$-28 sm:%s213_s19]   ;;  %s191_s7 = smov 48  ;;  %s196_s12 = smov 192  ;;  %149 = vrot.lane.b32.xlu0 %v148_v42, %s557_s6  ;;  %vm300_vm6 = vcmask 523520  }
  0x14   :  { %v216_v44 = vsel %vm38_vm0, %v516_v43, %v515_v41  ;;  %v517_v45 = vld [vmem:[%s891_s0 + $0x36] ss:$16 sm:%s218_s22]   ;;  %v518_v46 = vld [vmem:[%s891_s0 + $0xa] ss:$16 sm:%s223_s23]   ;;  %s266_s14 = smov 3  ;;  %s269_s15 = smov 12 }
  0x15   :  { %v221_v47 = vsel %vm43_vm1, %v517_v45, %v216_v44  ;;  %v511_v48 = vld [vmem:[%s891_s0 + $0x32] ss:$16 sm:%s183_s30]   ;;  %v513_v51 = vld [vmem:[%s891_s0 + $0x6] ss:$16 sm:%s191_s7]   ;;  %s237_s20 = smov 3  ;;  %s240_s21 = smov 12 }
  0x16   :  { %v226_v49 = vsel %vm48_vm2, %v518_v46, %v221_v47  ;;  %v512_v50 = vld [vmem:[%s891_s0 + $0x8a] ss:$-28 sm:%s186_s5]   ;;  %s245_s24 = smov 48  ;;  %s250_s29 = smov 192 }
  0x17   :  { %227 = vrot.lane.b32.xlu1 %v226_v49, %s558_s2  ;;  %v189_v52 = vsel %vm38_vm0, %v512_v50, %v511_v48  ;;  %v514_v53 = vld [vmem:[%s891_s0 - $0x26] ss:$16 sm:%s196_s12]   ;;  %s307_s7 = smov 3  ;;  %s310_s8 = smov 12 }
  0x18   :  { %v194_v54 = vsel %vm43_vm1, %v513_v51, %v189_v52  ;;  %v523_v55 = vld [vmem:[%s891_s0 + $0x8a] ss:$-28 sm:%s266_s14]   ;;  %s315_s11 = smov 48  ;;  %s320_s12 = smov 192  ;;  %v529_v2 = vld [vmem:[%s891_s0 + $0x31] ss:$16 sm:%s307_s7]  }
  0x19   :  { %v524_v56 = vld [vmem:[%s891_s0 + $0x5e] ss:$16 sm:%s269_s15]   ;;  %v199_v57 = vsel %vm48_vm2, %v514_v53, %v194_v54  ;;  %s281_s14 = smov 3  ;;  %v530_v3 = vld [vmem:[%s891_s0 + $0x89] ss:$-28 sm:%s310_s8]   ;;  %s284_s19 = smov 12 }
  0x1a   :  { %v272_v58 = vsel %vm38_vm0, %v524_v56, %v523_v55  ;;  %v519_v59 = vld [vmem:[%s891_s0 + $0x2a] ss:$-28 sm:%s237_s20]   ;;  %200 = vrot.lane.b32.xlu0 %v199_v57, %s558_s2  ;;  %s289_s20 = smov 48  ;;  %v313_v4 = vsel %vm38_vm0, %v530_v3, %v529_v2  ;;  %s294_s25 = smov 192 }
  0x1b   :  { %v520_v60 = vld [vmem:[%s891_s0 - $0x2] ss:$16 sm:%s240_s21]   ;;  %273 = vrot.lane.b32.xlu1 %v272_v58, %s558_s2  ;;  %s361_s27 = smov 3  ;;  %s364_s28 = smov 12 }
  0x1c   :  { %v243_v61 = vsel %vm38_vm0, %v520_v60, %v519_v59  ;;  %v521_v62 = vld [vmem:[%s891_s0 + $0xca] ss:$-28 sm:%s245_s24]   ;;  %v531_v5 = vld [vmem:[%s891_s0 + $0x5] ss:$16 sm:%s315_s11]   ;;  %s369_s5 = smov 48  ;;  %s374_s7 = smov 192 }
  0x1d   :  { %v248_v63 = vsel %vm43_vm1, %v521_v62, %v243_v61  ;;  %v522_v0 = vld [vmem:[%s891_s0 - $0x12] ss:$16 sm:%s250_s29]   ;;  %v532_v6 = vld [vmem:[%s891_s0 - $0x27] ss:$16 sm:%s320_s12]   ;;  %v318_v7 = vsel %vm43_vm1, %v531_v5, %v313_v4  ;;  %s559_s8 = smov 32   ;;  %s334_s11 = smov 3 }
  0x1e   :  { %v253_v1 = vsel %vm48_vm2, %v522_v0, %v248_v63  ;;  %v525_v8 = vld [vmem:[%s891_s0 + $0x1] ss:$16 sm:%s281_s14]   ;;  %v323_v9 = vsel %vm48_vm2, %v532_v6, %v318_v7  ;;  %v527_v11 = vld [vmem:[%s891_s0 - $0x2b] ss:$16 sm:%s289_s20]   ;;  %s337_s17 = smov 12  ;;  %s342_s18 = smov 48 }
  0x1f   :  { %254 = vrot.lane.b32.xlu0 %v253_v1, %s558_s2  ;;  %v526_v10 = vld [vmem:[%s891_s0 + $0x59] ss:$-28 sm:%s284_s19]   ;;  %324 = vrot.lane.b32.xlu1 %v323_v9, %s559_s8  ;;  %s347_s23 = smov 192  ;;  %s390_s2 = smov 3 }
  0x20   :  { %v287_v12 = vsel %vm38_vm0, %v526_v10, %v525_v8  ;;  %v528_v13 = vld [vmem:[%s891_s0 - $0x57] ss:$16 sm:%s294_s25]   ;;  %v488_v14 = vld [vmem:[%s891_s0 + $0x80] ss:$4 sm:$0xf]   ;;  %s393_s26 = smov 12 }
  0x21   :  { %v292_v15 = vsel %vm43_vm1, %v527_v11, %v287_v12  ;;  %v537_v16 = vld [vmem:[%s891_s0 + $0x29] ss:$-28 sm:%s361_s27]   ;;  %31 = vst.msk [vmem:[#allocation0 + $0x42] ss:$8 sm:$0xf] %vm3_vm3, %v488_v14  }
  0x22   :  { %v538_v17 = vld [vmem:[%s891_s0 - $0x3] ss:$16 sm:%s364_s28]   ;;  %v297_v18 = vsel %vm48_vm2, %v528_v13, %v292_v15  ;;  %v533_v23 = vld [vmem:[%s891_s0 + $0x61] ss:$16 sm:%s334_s11]  }
  0x23   :  { %v367_v19 = vsel %vm38_vm0, %v538_v17, %v537_v16  ;;  %v539_v20 = vld [vmem:[%s891_s0 + $0xc9] ss:$-28 sm:%s369_s5]   ;;  %298 = vrot.lane.b32.xlu0 %v297_v18, %s559_s8 }
  0x24   :  { %v540_v21 = vld [vmem:[%s891_s0 - $0x13] ss:$16 sm:%s374_s7]   ;;  %v372_v22 = vsel %vm43_vm1, %v539_v20, %v367_v19  ;;  %v535_v26 = vld [vmem:[%s891_s0 + $0x35] ss:$16 sm:%s342_s18]  }
  0x25   :  { %v377_v24 = vsel %vm48_vm2, %v540_v21, %v372_v22  ;;  %v534_v25 = vld [vmem:[%s891_s0 + $0xb9] ss:$-28 sm:%s337_s17]  }
  0x26   :  { %378 = vrot.lane.b32.xlu1 %v377_v24, %s559_s8  ;;  %v340_v27 = vsel %vm38_vm0, %v534_v25, %v533_v23  ;;  %v536_v28 = vld [vmem:[%s891_s0 + $0x9] ss:$16 sm:%s347_s23]  }
  0x27   :  { %v345_v29 = vsel %vm43_vm1, %v535_v26, %v340_v27  ;;  %v541_v30 = vld [vmem:[%s891_s0 + $0x89] ss:$-28 sm:%s390_s2]  }
  0x28   :  { %v542_v31 = vld [vmem:[%s891_s0 + $0x5d] ss:$16 sm:%s393_s26]   ;;  %v350_v32 = vsel %vm48_vm2, %v536_v28, %v345_v29 }
  0x29   :  { %351 = vrot.lane.b32.xlu0 %v350_v32, %s559_s8  ;;  %v396_v33 = vsel %vm38_vm0, %v542_v31, %v541_v30 }
  0x2d   :  { %397 = vrot.lane.b32.xlu0 %v396_v33, %s559_s8 }
  0x78   :  { %v104_v34 = vpop.permute.xlu1 %103  }
  0x79   :  { %107 = vst.msk [vmem:[#allocation0 + $0x40] sm:$0x7] %vm52_vm4, %v104_v34   ;;  %109 = vst.msk [vmem:[#allocation0 + $0x45] sm:$0x38] %vm52_vm4, %v104_v34  }
  0x7a   :  { %111 = vst.msk [vmem:[#allocation0 + $0x4a] sm:$0xc0] %vm52_vm4, %v104_v34  }
  0x7b   :  { %v51_v35 = vpop.permute.xlu0 %50  }
  0x7c   :  { %53 = vst.msk [vmem:[#allocation0] sm:$0x7] %vm52_vm4, %v51_v35   ;;  %55 = vst.msk [vmem:[#allocation0 + $0x5] sm:$0x38] %vm52_vm4, %v51_v35  }
  0x7d   :  { %57 = vst.msk [vmem:[#allocation0 + $0xa] sm:$0xc0] %vm52_vm4, %v51_v35  }
  0x7e   :  { %v131_v36 = vpop.permute.xlu1 %130  }
  0x7f   :  { %134 = vst.msk [vmem:[#allocation0 + $0x12] ss:$6 sm:$0x3] %vm52_vm4, %v131_v36   ;;  %136 = vst.msk [vmem:[#allocation0 + $0x17] sm:$0xc] %vm52_vm4, %v131_v36  }
  0x80   :  { %138 = vst.msk [vmem:[#allocation0 + $0x1a] ss:$6 sm:$0x30] %vm52_vm4, %v131_v36   ;;  %140 = vst.msk [vmem:[#allocation0 + $0x33] sm:$0xc0] %vm52_vm4, %v131_v36  }
  0x81   :  { %v77_v37 = vpop.permute.xlu0 %76  }
  0x82   :  { %80 = vst.msk [vmem:[#allocation0 + $0x20] sm:$0x7] %vm52_vm4, %v77_v37   ;;  %82 = vst.msk [vmem:[#allocation0 + $0x25] sm:$0x38] %vm52_vm4, %v77_v37  }
  0x83   :  { %84 = vst.msk [vmem:[#allocation0 + $0x2a] sm:$0xc0] %vm52_vm4, %v77_v37  }
  0x84   :  { %v175_v38 = vpop.permute.xlu1 %174  }
  0x85   :  { %177 = vst.msk [vmem:[#allocation0] sm:$0x7] %vm176_vm5, %v175_v38   ;;  %179 = vst.msk [vmem:[#allocation0 + $0x5] sm:$0x38] %vm176_vm5, %v175_v38   ;;  %v150_v39 = vpop.permute.xlu0 %149  }
  0x86   :  { %181 = vst.msk [vmem:[#allocation0 + $0xa] sm:$0xc0] %vm176_vm5, %v175_v38  }
  0x87   :  { %153 = vst.msk [vmem:[#allocation0 + $0x52] ss:$6 sm:$0x3] %vm52_vm4, %v150_v39   ;;  %155 = vst.msk [vmem:[#allocation0 + $0x57] sm:$0xc] %vm52_vm4, %v150_v39  }
  0x89   :  { %v228_v40 = vpop.permute.xlu1 %227  }
  0x8a   :  { %231 = vst.msk [vmem:[#allocation0 + $0x40] sm:$0x7] %vm176_vm5, %v228_v40   ;;  %233 = vst.msk [vmem:[#allocation0 + $0x45] sm:$0x38] %vm176_vm5, %v228_v40  }
  0x8b   :  { %235 = vst.msk [vmem:[#allocation0 + $0x4a] sm:$0xc0] %vm176_vm5, %v228_v40  }
  0x8c   :  { %v201_v41 = vpop.permute.xlu0 %200  }
  0x8d   :  { %204 = vst.msk [vmem:[#allocation0 + $0x20] sm:$0x7] %vm176_vm5, %v201_v41   ;;  %206 = vst.msk [vmem:[#allocation0 + $0x25] sm:$0x38] %vm176_vm5, %v201_v41   ;;  %v274_v42 = vpop.permute.xlu1 %273  }
  0x8e   :  { %208 = vst.msk [vmem:[#allocation0 + $0x2a] sm:$0xc0] %vm176_vm5, %v201_v41   ;;  %277 = vst.msk [vmem:[#allocation0 + $0x52] ss:$6 sm:$0x3] %vm176_vm5, %v274_v42  }
  0x8f   :  { %279 = vst.msk [vmem:[#allocation0 + $0x57] sm:$0xc] %vm176_vm5, %v274_v42  }
  0x91   :  { %v255_v43 = vpop.permute.xlu0 %254   ;;  %v325_v44 = vpop.permute.xlu1 %324  }
  0x92   :  { %258 = vst.msk [vmem:[#allocation0 + $0x12] ss:$6 sm:$0x3] %vm176_vm5, %v255_v43   ;;  %260 = vst.msk [vmem:[#allocation0 + $0x17] sm:$0xc] %vm176_vm5, %v255_v43  }
  0x93   :  { %262 = vst.msk [vmem:[#allocation0 + $0x1a] ss:$6 sm:$0x30] %vm176_vm5, %v255_v43   ;;  %264 = vst.msk [vmem:[#allocation0 + $0x33] sm:$0xc0] %vm176_vm5, %v255_v43  }
  0x94   :  { %328 = vst.msk [vmem:[#allocation0 + $0x20] sm:$0x7] %vm300_vm6, %v325_v44   ;;  %330 = vst.msk [vmem:[#allocation0 + $0x25] sm:$0x38] %vm300_vm6, %v325_v44  }
  0x95   :  { %332 = vst.msk [vmem:[#allocation0 + $0x2a] sm:$0xc0] %vm300_vm6, %v325_v44   ;;  %v299_v45 = vpop.permute.xlu0 %298  }
  0x96   :  { %301 = vst.msk [vmem:[#allocation0] sm:$0x7] %vm300_vm6, %v299_v45   ;;  %303 = vst.msk [vmem:[#allocation0 + $0x5] sm:$0x38] %vm300_vm6, %v299_v45  }
  0x97   :  { %305 = vst.msk [vmem:[#allocation0 + $0xa] sm:$0xc0] %vm300_vm6, %v299_v45  }
  0x98   :  { %v379_v46 = vpop.permute.xlu1 %378  }
  0x99   :  { %382 = vst.msk [vmem:[#allocation0 + $0x12] ss:$6 sm:$0x3] %vm300_vm6, %v379_v46   ;;  %384 = vst.msk [vmem:[#allocation0 + $0x17] sm:$0xc] %vm300_vm6, %v379_v46  }
  0x9a   :  { %386 = vst.msk [vmem:[#allocation0 + $0x1a] ss:$6 sm:$0x30] %vm300_vm6, %v379_v46   ;;  %388 = vst.msk [vmem:[#allocation0 + $0x33] sm:$0xc0] %vm300_vm6, %v379_v46  }
  0x9b   :  { %v428_v47 = vld [vmem:[#allocation0 + $0x20] sm:$0xf]  ;;  %v434_v48 = vld [vmem:[#allocation0 + $0x28] sm:$0xf]  ;;  %v352_v49 = vpop.permute.xlu0 %351  }
  0x9c   :  { %546 = vst [vmem:[%s892_s1 + $0x10] sm:$0xf] %v428_v47  ;;  %547 = vst [vmem:[%s892_s1 + $0x14] sm:$0xf] %v434_v48 }
  0x9d   :  { %355 = vst.msk [vmem:[#allocation0 + $0x40] sm:$0x7] %vm300_vm6, %v352_v49   ;;  %357 = vst.msk [vmem:[#allocation0 + $0x45] sm:$0x38] %vm300_vm6, %v352_v49   ;;  %v407_v50 = vld [vmem:[#allocation0] sm:$0xf] }
  0x9e   :  { %359 = vst.msk [vmem:[#allocation0 + $0x4a] sm:$0xc0] %vm300_vm6, %v352_v49   ;;  %v411_v51 = vld [vmem:[#allocation0 + $0x8] sm:$0xf]  ;;  %409 = vst [vmem:[%s892_s1] sm:$0xf] %v407_v50 }
  0x9f   :  { %543 = vst [vmem:[%s892_s1 + $0x4] sm:$0xf] %v411_v51  ;;  %v398_v52 = vpop.permute.xlu0 %397  }
  0xa0   :  { %v416_v53 = vld [vmem:[#allocation0 + $0x10] sm:$0xf]  ;;  %v422_v54 = vld [vmem:[#allocation0 + $0x18] sm:$0xf]  ;;  %403 = vst.msk [vmem:[#allocation0 + $0x57] sm:$0xc] %vm300_vm6, %v398_v52  }
  0xa1   :  { %v446_v55 = vld [vmem:[#allocation0 + $0x38] sm:$0xf]  ;;  %401 = vst.msk [vmem:[#allocation0 + $0x52] ss:$6 sm:$0x3] %vm300_vm6, %v398_v52  }
  0xa2   :  { %544 = vst [vmem:[%s892_s1 + $0x8] sm:$0xf] %v416_v53  ;;  %545 = vst [vmem:[%s892_s1 + $0xc] sm:$0xf] %v422_v54  ;;  %v440_v56 = vld [vmem:[#allocation0 + $0x30] sm:$0xf] }
  0xa3   :  { %549 = vst [vmem:[%s892_s1 + $0x1c] sm:$0xf] %v446_v55  ;;  %548 = vst [vmem:[%s892_s1 + $0x18] sm:$0xf] %v440_v56 }
  0xa4   :  { %v452_v57 = vld [vmem:[#allocation0 + $0x40] sm:$0xf]  ;;  %v458_v58 = vld [vmem:[#allocation0 + $0x48] sm:$0xf] }
  0xa5   :  { %550 = vst [vmem:[%s892_s1 + $0x20] sm:$0xf] %v452_v57  ;;  %551 = vst [vmem:[%s892_s1 + $0x24] sm:$0xf] %v458_v58 }
  0xa8   :  { %v464_v59 = vld [vmem:[#allocation0 + $0x50] sm:$0xf]  ;;  %v470_v60 = vld [vmem:[#allocation0 + $0x58] sm:$0xf] }
  0xa9   :  { %552 = vst [vmem:[%s892_s1 + $0x28] sm:$0xf] %v464_v59  ;;  %553 = vst [vmem:[%s892_s1 + $0x2c] sm:$0xf] %v470_v60 }

// kernel: tile.38
= control target key start
LH: loop header
LB: loop body
LE: loop exit
PB: predicated region body
PF: predicated region fallthrough
CT: control target
= control target key end

     0   :  { %s28_s0 = inlined_call_operand.vmem [shape: f32[32], index: 0, kind: input, shape index: {}]   ;;  %s29_s1 = inlined_call_operand.vmem [shape: f32[16,32], index: 1, kind: output, shape index: {}]  }
   0x1   :  { %v4_v0 = vld [vmem:[%s28_s0] ss:$0 sm:$0xff] }
   0x2   :  { %5 = vst [vmem:[%s29_s1] sm:$0xff] %v4_v0  ;;  %8 = vst [vmem:[%s29_s1 + $0x8] sm:$0xff] %v4_v0 }

// kernel: tile.39
= control target key start
LH: loop header
LB: loop body
LE: loop exit
PB: predicated region body
PF: predicated region fallthrough
CT: control target
= control target key end

     0   :  { %s57_s8 = smov 96   ;;  %vm3_vm0 = vcmask 261120   ;;  %s59_s15 = smov 64   ;;  %vm9_vm1 = vcmask 1048320   ;;  %vm15_vm2 = vcmask 785920   ;;  %vm21_vm3 = vcmask 523520   ;;  %s94_s0 = inlined_call_operand.vmem [shape: f32[16,32], index: 0, kind: input, shape index: {}]   ;;  %s95_s1 = inlined_call_operand.vmem [shape: f32[1,512], index: 1, kind: output, shape index: {}]  }
   0x1   :  { %v48_v0 = vld [vmem:[%s94_s0 + $0x3] ss:$4 sm:$0xf]   ;;  %v49_v1 = vld [vmem:[%s94_s0 + $0x2] ss:$4 sm:$0xf]  }
   0x2   :  { %7 = vrot.lane.b32.xlu0 %v48_v0, %s57_s8  ;;  %v50_v2 = vld [vmem:[%s94_s0 + $0x1] ss:$4 sm:$0xf]   ;;  %v2_v3 = vld [vmem:[%s94_s0] ss:$4 sm:$0xf]  }
   0x3   :  { %s58_s0 = smov 32   ;;  %4 = vst.msk [vmem:[#allocation0] ss:$8 sm:$0xf] %vm3_vm0, %v2_v3  }
   0x4   :  { %19 = vrot.lane.b32.xlu1 %v50_v2, %s58_s0 }
   0x6   :  { %13 = vrot.lane.b32.xlu0 %v49_v1, %s59_s15 }
  0x74   :  { %v8_v4 = vpop.permute.xlu0 %7  }
  0x75   :  { %10 = vst.msk [vmem:[#allocation0] ss:$8 sm:$0xf] %vm9_vm1, %v8_v4  }
  0x76   :  { %v20_v5 = vpop.permute.xlu1 %19  }
  0x78   :  { %v14_v6 = vpop.permute.xlu0 %13  }
  0x79   :  { %16 = vst.msk [vmem:[#allocation0] ss:$8 sm:$0xf] %vm15_vm2, %v14_v6  }
  0x7a   :  { %22 = vst.msk [vmem:[#allocation0] ss:$8 sm:$0xf] %vm21_vm3, %v20_v5  }
  0x81   :  { %v26_v7 = vld [vmem:[#allocation0] sm:$0x1]  ;;  %v30_v8 = vld [vmem:[#allocation0 + $0x8] sm:$0x1]  ;;  %v35_v9 = vld [vmem:[#allocation0 + $0x10] sm:$0x1] }
  0x82   :  { %28 = vst [vmem:[%s95_s1] sm:$0x1] %v26_v7  ;;  %51 = vst [vmem:[%s95_s1 + $0x1] sm:$0x1] %v30_v8  ;;  %v41_v10 = vld [vmem:[#allocation0 + $0x18] sm:$0x1] }
  0x83   :  { %52 = vst [vmem:[%s95_s1 + $0x2] sm:$0x1] %v35_v9  ;;  %53 = vst [vmem:[%s95_s1 + $0x3] sm:$0x1] %v41_v10 }

// kernel: tile.48
= control target key start
LH: loop header
LB: loop body
LE: loop exit
PB: predicated region body
PF: predicated region fallthrough
CT: control target
= control target key end

     0   :  { %s22_s0 = inlined_call_operand.vmem [shape: f32[32], index: 0, kind: input, shape index: {}]   ;;  %s23_s1 = inlined_call_operand.vmem [shape: f32[8,32], index: 1, kind: output, shape index: {}]  }
   0x1   :  { %v4_v0 = vld [vmem:[%s22_s0] ss:$0 sm:$0xff] }
   0x2   :  { %5 = vst [vmem:[%s23_s1] sm:$0xff] %v4_v0 }

// kernel: tile.44
= control target key start
LH: loop header
LB: loop body
LE: loop exit
PB: predicated region body
PF: predicated region fallthrough
CT: control target
= control target key end

     0   :  { %s67_s6 = smov 3  ;;  %vm31_vm0 = vcmask 1045507   ;;  %s34_s13 = smov 192  ;;  %vm36_vm1 = vcmask 1047558   ;;  %vm3_vm2 = vcmask 261120   ;;  %vm40_vm3 = vcmask 1048320   ;;  %s369_s0 = inlined_call_operand.vmem [shape: f32[3,3,8,32], index: 0, kind: input, shape index: {}]   ;;  %s370_s1 = inlined_call_operand.vmem [shape: f32[3,3,256], index: 1, kind: output, shape index: {}]  }
   0x1   :  { %v209_v0 = vld [vmem:[%s369_s0 + $0x3] ss:$8 sm:$0x7]   ;;  %v215_v1 = vld [vmem:[%s369_s0 + $0x27] ss:$8 sm:%s67_s6]   ;;  %s238_s14 = smov 96  }
   0x2   :  { %v210_v2 = vld [vmem:[%s369_s0 - $0x11] ss:$8 sm:$0x38]   ;;  %69 = vrot.lane.b32.xlu1 %v215_v1, %s238_s14  ;;  %v211_v4 = vld [vmem:[%s369_s0 - $0x15] ss:$8 sm:%s34_s13]   ;;  %s81_s21 = smov 192 }
   0x3   :  { %v32_v3 = vsel %vm31_vm0, %v210_v2, %v209_v0  ;;  %v216_v5 = vld [vmem:[%s369_s0 + $0x2] ss:$8 sm:$0x7]   ;;  %v217_v7 = vld [vmem:[%s369_s0 - $0x12] ss:$8 sm:$0x38]  }
   0x4   :  { %v37_v6 = vsel %vm36_vm1, %v211_v4, %v32_v3  ;;  %v79_v8 = vsel %vm31_vm0, %v217_v7, %v216_v5  ;;  %v218_v9 = vld [vmem:[%s369_s0 - $0x16] ss:$8 sm:%s81_s21]   ;;  %v212_v10 = vld [vmem:[%s369_s0 + $0x33] ss:$8 sm:$0x7]   ;;  %s53_s26 = smov 192 }
   0x5   :  { %38 = vrot.lane.b32.xlu0 %v37_v6, %s238_s14  ;;  %v84_v11 = vsel %vm36_vm1, %v218_v9, %v79_v8  ;;  %v213_v12 = vld [vmem:[%s369_s0 + $0x1f] ss:$8 sm:$0x38]   ;;  %s114_s2 = smov 3  ;;  %s239_s3 = smov 64   ;;  %vm87_vm4 = vcmask 785920  }
   0x6   :  { %v214_v13 = vld [vmem:[%s369_s0 + $0x73] ss:$-12 sm:%s53_s26]   ;;  %85 = vrot.lane.b32.xlu1 %v84_v11, %s239_s3  ;;  %v51_v14 = vsel %vm31_vm0, %v213_v12, %v212_v10  ;;  %v219_v16 = vld [vmem:[%s369_s0 + $0x32] ss:$8 sm:$0x7]   ;;  %s100_s8 = smov 192 }
   0x7   :  { %v222_v15 = vld [vmem:[%s369_s0 + $0x26] ss:$8 sm:%s114_s2]   ;;  %v56_v17 = vsel %vm36_vm1, %v214_v13, %v51_v14  ;;  %v226_v21 = vld [vmem:[%s369_s0 + $0x31] ss:$8 sm:$0x7]   ;;  %s147_s17 = smov 192 }
   0x8   :  { %v220_v18 = vld [vmem:[%s369_s0 + $0x1e] ss:$8 sm:$0x38]   ;;  %v227_v22 = vld [vmem:[%s369_s0 + $0x1d] ss:$8 sm:$0x38]  }
   0x9   :  { %v221_v19 = vld [vmem:[%s369_s0 + $0x72] ss:$-12 sm:%s100_s8]   ;;  %57 = vrot.lane.b32.xlu0 %v56_v17, %s238_s14  ;;  %v98_v20 = vsel %vm31_vm0, %v220_v18, %v219_v16  ;;  %v145_v24 = vsel %vm31_vm0, %v227_v22, %v226_v21  ;;  %v223_v25 = vld [vmem:[%s369_s0 + $0x1] ss:$8 sm:$0x7]   ;;  %s128_s20 = smov 192 }
   0xa   :  { %v103_v23 = vsel %vm36_vm1, %v221_v19, %v98_v20  ;;  %116 = vrot.lane.b32.xlu1 %v222_v15, %s239_s3  ;;  %v228_v26 = vld [vmem:[%s369_s0 + $0x71] ss:$-12 sm:%s147_s17]   ;;  %s22_s27 = smov 3  ;;  %v207_v31 = vld [vmem:[%s369_s0 + $0x20] ss:$4 sm:$0xff]   ;;  %s240_s5 = smov 32  }
   0xb   :  { %v224_v27 = vld [vmem:[%s369_s0 - $0x13] ss:$8 sm:$0x38]   ;;  %v150_v28 = vsel %vm36_vm1, %v228_v26, %v145_v24  ;;  %v225_v30 = vld [vmem:[%s369_s0 - $0x17] ss:$8 sm:%s128_s20]   ;;  %s161_s6 = smov 3 }
   0xc   :  { %v126_v29 = vsel %vm31_vm0, %v224_v27, %v223_v25  ;;  %v2_v32 = vld [vmem:[%s369_s0] ss:$4 sm:$0xff]   ;;  %15 = vst.msk [vmem:[#allocation0 + $0x11] ss:$8 sm:$0x3] %vm3_vm2, %v207_v31   ;;  %vm134_vm5 = vcmask 523520  }
   0xd   :  { %104 = vrot.lane.b32.xlu0 %v103_v23, %s239_s3  ;;  %v131_v33 = vsel %vm36_vm1, %v225_v30, %v126_v29  ;;  %17 = vst.msk [vmem:[#allocation0 + $0x2] ss:$8 sm:$0xc] %vm3_vm2, %v207_v31   ;;  %18 = vst.msk [vmem:[#allocation0] ss:$8 sm:$0x30] %vm3_vm2, %v207_v31  }
   0xe   :  { %20 = vst.msk [vmem:[#allocation0 - $0xf] ss:$8 sm:$0xc0] %vm3_vm2, %v207_v31   ;;  %4 = vst.msk [vmem:[#allocation0] ss:$8 sm:$0x3] %vm3_vm2, %v2_v32   ;;  %151 = vrot.lane.b32.xlu1 %v150_v28, %s240_s5 }
   0xf   :  { %6 = vst.msk [vmem:[#allocation0 - $0xf] ss:$8 sm:$0xc] %vm3_vm2, %v2_v32   ;;  %8 = vst.msk [vmem:[#allocation0 - $0x1e] ss:$8 sm:$0x30] %vm3_vm2, %v2_v32  }
  0x10   :  { %10 = vst.msk [vmem:[#allocation0 - $0x20] ss:$8 sm:$0xc0] %vm3_vm2, %v2_v32   ;;  %v208_v34 = vld [vmem:[%s369_s0 + $0x40] ss:$4 sm:%s22_s27]  }
  0x11   :  { %26 = vst.msk [vmem:[#allocation0 + $0x22] ss:$8 sm:$0x3] %vm3_vm2, %v208_v34   ;;  %132 = vrot.lane.b32.xlu0 %v131_v33, %s240_s5  ;;  %v229_v35 = vld [vmem:[%s369_s0 + $0x25] ss:$8 sm:%s161_s6]  }
  0x15   :  { %163 = vrot.lane.b32.xlu0 %v229_v35, %s240_s5 }
  0x74   :  { %v70_v36 = vpop.permute.xlu1 %69  }
  0x75   :  { %73 = vst.msk [vmem:[#allocation0 + $0x19] sm:$0x3] %vm40_vm3, %v70_v36  }
  0x77   :  { %v39_v37 = vpop.permute.xlu0 %38  }
  0x78   :  { %41 = vst.msk [vmem:[#allocation0] sm:$0x7] %vm40_vm3, %v39_v37   ;;  %43 = vst.msk [vmem:[#allocation0 + $0x5] sm:$0x38] %vm40_vm3, %v39_v37   ;;  %v86_v38 = vpop.permute.xlu1 %85  }
  0x79   :  { %45 = vst.msk [vmem:[#allocation0 + $0xa] sm:$0xc0] %vm40_vm3, %v39_v37  }
  0x7a   :  { %88 = vst.msk [vmem:[#allocation0] sm:$0x7] %vm87_vm4, %v86_v38   ;;  %90 = vst.msk [vmem:[#allocation0 + $0x5] sm:$0x38] %vm87_vm4, %v86_v38  }
  0x7b   :  { %92 = vst.msk [vmem:[#allocation0 + $0xa] sm:$0xc0] %vm87_vm4, %v86_v38   ;;  %v58_v39 = vpop.permute.xlu0 %57  }
  0x7c   :  { %61 = vst.msk [vmem:[#allocation0 + $0x20] sm:$0x7] %vm40_vm3, %v58_v39   ;;  %63 = vst.msk [vmem:[#allocation0 + $0x25] sm:$0x38] %vm40_vm3, %v58_v39   ;;  %v117_v40 = vpop.permute.xlu1 %116  }
  0x7d   :  { %65 = vst.msk [vmem:[#allocation0 - $0x12] ss:$6 sm:$0xc0] %vm40_vm3, %v58_v39  }
  0x7e   :  { %120 = vst.msk [vmem:[#allocation0 + $0x19] sm:$0x3] %vm87_vm4, %v117_v40  }
  0x7f   :  { %v105_v41 = vpop.permute.xlu0 %104  }
  0x80   :  { %108 = vst.msk [vmem:[#allocation0 + $0x20] sm:$0x7] %vm87_vm4, %v105_v41   ;;  %110 = vst.msk [vmem:[#allocation0 + $0x25] sm:$0x38] %vm87_vm4, %v105_v41   ;;  %v152_v42 = vpop.permute.xlu1 %151  }
  0x81   :  { %112 = vst.msk [vmem:[#allocation0 - $0x12] ss:$6 sm:$0xc0] %vm87_vm4, %v105_v41  }
  0x82   :  { %155 = vst.msk [vmem:[#allocation0 + $0x20] sm:$0x7] %vm134_vm5, %v152_v42   ;;  %157 = vst.msk [vmem:[#allocation0 + $0x25] sm:$0x38] %vm134_vm5, %v152_v42  }
  0x83   :  { %159 = vst.msk [vmem:[#allocation0 - $0x12] ss:$6 sm:$0xc0] %vm134_vm5, %v152_v42   ;;  %v133_v43 = vpop.permute.xlu0 %132  }
  0x84   :  { %135 = vst.msk [vmem:[#allocation0] sm:$0x7] %vm134_vm5, %v133_v43   ;;  %137 = vst.msk [vmem:[#allocation0 + $0x5] sm:$0x38] %vm134_vm5, %v133_v43  }
  0x85   :  { %139 = vst.msk [vmem:[#allocation0 + $0xa] sm:$0xc0] %vm134_vm5, %v133_v43  }
  0x87   :  { %v164_v44 = vpop.permute.xlu0 %163  }
  0x88   :  { %167 = vst.msk [vmem:[#allocation0 + $0x19] sm:$0x3] %vm134_vm5, %v164_v44  }
  0x89   :  { %v192_v45 = vld [vmem:[#allocation0 + $0x20] sm:$0xf]  ;;  %v198_v46 = vld [vmem:[#allocation0 + $0x28] sm:$0xf] }
  0x8a   :  { %233 = vst [vmem:[%s370_s1 + $0x10] sm:$0xf] %v192_v45  ;;  %234 = vst [vmem:[%s370_s1 + $0x14] sm:$0xf] %v198_v46 }
  0x8b   :  { %v171_v47 = vld [vmem:[#allocation0] sm:$0xf]  ;;  %v175_v48 = vld [vmem:[#allocation0 + $0x8] sm:$0xf] }
  0x8c   :  { %v180_v49 = vld [vmem:[#allocation0 + $0x10] sm:$0xf]  ;;  %173 = vst [vmem:[%s370_s1] sm:$0xf] %v171_v47  ;;  %230 = vst [vmem:[%s370_s1 + $0x4] sm:$0xf] %v175_v48 }
  0x8d   :  { %231 = vst [vmem:[%s370_s1 + $0x8] sm:$0xf] %v180_v49 }
  0x8f   :  { %v186_v50 = vld [vmem:[#allocation0 + $0x18] sm:$0xf] }
  0x90   :  { %232 = vst [vmem:[%s370_s1 + $0xc] sm:$0xf] %v186_v50 }

// kernel: tile.49
= control target key start
LH: loop header
LB: loop body
LE: loop exit
PB: predicated region body
PF: predicated region fallthrough
CT: control target
= control target key end

     0   :  { %s7_s6 = smov 3  ;;  %s14_s9 = smov 3  ;;  %vm4_vm0 = vcmask 261120   ;;  %vm11_vm1 = vcmask 1048320   ;;  %vm18_vm2 = vcmask 785920   ;;  %vm25_vm3 = vcmask 523520   ;;  %s76_s0 = inlined_call_operand.vmem [shape: f32[8,32], index: 0, kind: input, shape index: {}]   ;;  %s77_s1 = inlined_call_operand.vmem [shape: f32[1,256], index: 1, kind: output, shape index: {}]  }
   0x1   :  { %v38_v0 = vld [vmem:[%s76_s0 + $0x3] ss:$4 sm:%s7_s6]   ;;  %s45_s10 = smov 96   ;;  %s21_s11 = smov 3  ;;  %v39_v1 = vld [vmem:[%s76_s0 + $0x2] ss:$4 sm:%s14_s9]  }
   0x2   :  { %9 = vrot.lane.b32.xlu0 %v38_v0, %s45_s10  ;;  %v40_v2 = vld [vmem:[%s76_s0 + $0x1] ss:$4 sm:%s21_s11]   ;;  %s2_s16 = smov 3  ;;  %s46_s17 = smov 32  }
   0x3   :  { %23 = vrot.lane.b32.xlu1 %v40_v2, %s46_s17  ;;  %v3_v3 = vld [vmem:[%s76_s0] ss:$4 sm:%s2_s16]   ;;  %s47_s0 = smov 64  }
   0x4   :  { %5 = vst.msk [vmem:[#allocation0] ss:$8 sm:$0x3] %vm4_vm0, %v3_v3  }
   0x6   :  { %16 = vrot.lane.b32.xlu0 %v39_v1, %s47_s0 }
  0x74   :  { %v10_v4 = vpop.permute.xlu0 %9  }
  0x75   :  { %12 = vst.msk [vmem:[#allocation0] ss:$8 sm:$0x3] %vm11_vm1, %v10_v4   ;;  %v24_v5 = vpop.permute.xlu1 %23  }
  0x78   :  { %v17_v6 = vpop.permute.xlu0 %16  }
  0x79   :  { %19 = vst.msk [vmem:[#allocation0] ss:$8 sm:$0x3] %vm18_vm2, %v17_v6  }
  0x7a   :  { %26 = vst.msk [vmem:[#allocation0] ss:$8 sm:$0x3] %vm25_vm3, %v24_v5  }
  0x81   :  { %v30_v7 = vld [vmem:[#allocation0] sm:$0x1]  ;;  %v34_v8 = vld [vmem:[#allocation0 + $0x8] sm:$0x1] }
  0x82   :  { %32 = vst [vmem:[%s77_s1] sm:$0x1] %v30_v7  ;;  %41 = vst [vmem:[%s77_s1 + $0x1] sm:$0x1] %v34_v8 }

// kernel: tile.54
= control target key start
LH: loop header
LB: loop body
LE: loop exit
PB: predicated region body
PF: predicated region fallthrough
CT: control target
= control target key end

     0   :  { %vm47_vm0 = vcmask 1047556   ;;  %vm49_vm1 = vcmask 261120   ;;  %s162_s24 = smov 96   ;;  %s163_s25 = smov 32   ;;  %vm68_vm2 = vcmask 1048320   ;;  %vm89_vm3 = vcmask 785920   ;;  %s218_s0 = inlined_call_operand.vmem [shape: f32[3,3,4,32], index: 0, kind: input, shape index: {}]   ;;  %s219_s1 = inlined_call_operand.vmem [shape: f32[3,3,128], index: 1, kind: output, shape index: {}]  }
   0x1   :  { %v148_v0 = vld [vmem:[%s218_s0 + $0x20] sm:$0xf]  ;;  %v149_v1 = vld [vmem:[%s218_s0 + $0x1c] sm:$0xf]  ;;  %v150_v2 = vld [vmem:[%s218_s0 + $0x18] sm:$0xf] }
   0x2   :  { %8 = vst [vmem:[#allocation1 + $0x40] sm:$0xf] %v148_v0  ;;  %13 = vst [vmem:[#allocation1 + $0x38] sm:$0xf] %v149_v1  ;;  %v151_v3 = vld [vmem:[%s218_s0 + $0x14] sm:$0xf] }
   0x3   :  { %v152_v4 = vld [vmem:[%s218_s0 + $0x10] sm:$0xf]  ;;  %18 = vst [vmem:[#allocation1 + $0x30] sm:$0xf] %v150_v2  ;;  %23 = vst [vmem:[#allocation1 + $0x28] sm:$0xf] %v151_v3 }
   0x4   :  { %28 = vst [vmem:[#allocation1 + $0x20] sm:$0xf] %v152_v4  ;;  %v153_v5 = vld [vmem:[%s218_s0 + $0xc] sm:$0xf]  ;;  %v154_v6 = vld [vmem:[%s218_s0 + $0x8] sm:$0xf] }
   0x5   :  { %v155_v7 = vld [vmem:[%s218_s0 + $0x4] sm:$0xf]  ;;  %33 = vst [vmem:[#allocation1 + $0x18] sm:$0xf] %v153_v5  ;;  %38 = vst [vmem:[#allocation1 + $0x10] sm:$0xf] %v154_v6 }
   0x6   :  { %42 = vst [vmem:[#allocation1 + $0x8] sm:$0xf] %v155_v7  ;;  %v43_v8 = vld [vmem:[%s218_s0] sm:$0xf]  ;;  %s161_s0 = smov 64   ;;  %vm110_vm4 = vcmask 523520  }
   0x7   :  { %44 = vst [vmem:[#allocation1] sm:$0xf] %v43_v8 }
   0x9   :  { %v96_v9 = vld [vmem:[#allocation1 + $0x42] sm:$0x1]   ;;  %v75_v10 = vld [vmem:[#allocation1 + $0x43] sm:$0x1]   ;;  %v56_v14 = vld [vmem:[#allocation1 + $0x40] sm:$0x1]  }
   0xa   :  { %97 = vrot.lane.b32.xlu1 %v96_v9, %s161_s0  ;;  %76 = vrot.lane.b32.xlu0 %v75_v10, %s162_s24  ;;  %59 = vst.msk [vmem:[#allocation0 + $0x12] sm:$0x1] %vm49_vm1, %v56_v14   ;;  %v117_v22 = vld [vmem:[#allocation1 + $0x41] sm:$0x1]  }
   0xb   :  { %v84_v11 = vld [vmem:[#allocation1 + $0x2] ss:$8 sm:$0xf0]   ;;  %v63_v12 = vld [vmem:[#allocation1 + $0x3] ss:$8 sm:$0xf0]  }
   0xc   :  { %v105_v13 = vld [vmem:[#allocation1 + $0x1] ss:$8 sm:$0xf0]   ;;  %v46_v21 = vld [vmem:[#allocation1] ss:$8 sm:$0xf0]  }
   0xe   :  { %v82_v15 = vld [vmem:[#allocation1 + $0x2] ss:$8 sm:$0xf]   ;;  %v61_v16 = vld [vmem:[#allocation1 + $0x3] ss:$8 sm:$0xf]  }
   0xf   :  { %v86_v17 = vsel %vm47_vm0, %v84_v11, %v82_v15  ;;  %v65_v18 = vsel %vm47_vm0, %v63_v12, %v61_v16  ;;  %v103_v19 = vld [vmem:[#allocation1 + $0x1] ss:$8 sm:$0xf]   ;;  %v45_v20 = vld [vmem:[#allocation1] ss:$8 sm:$0xf]  }
  0x10   :  { %87 = vrot.lane.b32.xlu1 %v86_v17, %s161_s0  ;;  %66 = vrot.lane.b32.xlu0 %v65_v18, %s162_s24  ;;  %v107_v23 = vsel %vm47_vm0, %v105_v13, %v103_v19  ;;  %v48_v24 = vsel %vm47_vm0, %v46_v21, %v45_v20 }
  0x11   :  { %50 = vst.msk [vmem:[#allocation0] sm:$0x7] %vm49_vm1, %v48_v24   ;;  %52 = vst.msk [vmem:[#allocation0 + $0x5] sm:$0x38] %vm49_vm1, %v48_v24  }
  0x12   :  { %54 = vst.msk [vmem:[#allocation0 + $0xa] sm:$0xc0] %vm49_vm1, %v48_v24  }
  0x14   :  { %118 = vrot.lane.b32.xlu1 %v117_v22, %s163_s25  ;;  %108 = vrot.lane.b32.xlu0 %v107_v23, %s163_s25 }
  0x7c   :  { %v98_v25 = vpop.permute.xlu1 %97   ;;  %v77_v26 = vpop.permute.xlu0 %76  }
  0x7d   :  { %80 = vst.msk [vmem:[#allocation0 + $0x12] sm:$0x1] %vm68_vm2, %v77_v26  }
  0x7e   :  { %101 = vst.msk [vmem:[#allocation0 + $0x12] sm:$0x1] %vm89_vm3, %v98_v25  }
  0x82   :  { %v88_v27 = vpop.permute.xlu1 %87   ;;  %v67_v28 = vpop.permute.xlu0 %66  }
  0x83   :  { %69 = vst.msk [vmem:[#allocation0] sm:$0x7] %vm68_vm2, %v67_v28   ;;  %71 = vst.msk [vmem:[#allocation0 + $0x5] sm:$0x38] %vm68_vm2, %v67_v28  }
  0x84   :  { %73 = vst.msk [vmem:[#allocation0 + $0xa] sm:$0xc0] %vm68_vm2, %v67_v28  }
  0x85   :  { %90 = vst.msk [vmem:[#allocation0] sm:$0x7] %vm89_vm3, %v88_v27   ;;  %92 = vst.msk [vmem:[#allocation0 + $0x5] sm:$0x38] %vm89_vm3, %v88_v27  }
  0x86   :  { %94 = vst.msk [vmem:[#allocation0 + $0xa] sm:$0xc0] %vm89_vm3, %v88_v27   ;;  %v119_v29 = vpop.permute.xlu1 %118   ;;  %v109_v30 = vpop.permute.xlu0 %108  }
  0x87   :  { %122 = vst.msk [vmem:[#allocation0 + $0x12] sm:$0x1] %vm110_vm4, %v119_v29   ;;  %111 = vst.msk [vmem:[#allocation0] sm:$0x7] %vm110_vm4, %v109_v30  }
  0x88   :  { %113 = vst.msk [vmem:[#allocation0 + $0x5] sm:$0x38] %vm110_vm4, %v109_v30   ;;  %115 = vst.msk [vmem:[#allocation0 + $0xa] sm:$0xc0] %vm110_vm4, %v109_v30  }
  0x8e   :  { %v126_v31 = vld [vmem:[#allocation0] sm:$0xf] }
  0x8f   :  { %v130_v32 = vld [vmem:[#allocation0 + $0x8] sm:$0xf]  ;;  %v135_v33 = vld [vmem:[#allocation0 + $0x10] sm:$0xf]  ;;  %128 = vst [vmem:[%s219_s1] sm:$0xf] %v126_v31 }
  0x90   :  { %156 = vst [vmem:[%s219_s1 + $0x4] sm:$0xf] %v130_v32  ;;  %157 = vst [vmem:[%s219_s1 + $0x8] sm:$0xf] %v135_v33 }

// kernel: tile.58
= control target key start
LH: loop header
LB: loop body
LE: loop exit
PB: predicated region body
PF: predicated region fallthrough
CT: control target
= control target key end

     0   :  { %s22_s0 = inlined_call_operand.vmem [shape: f32[32], index: 0, kind: input, shape index: {}]   ;;  %s23_s1 = inlined_call_operand.vmem [shape: f32[4,32], index: 1, kind: output, shape index: {}]  }
   0x1   :  { %v4_v0 = vld [vmem:[%s22_s0] ss:$0 sm:$0xff] }
   0x2   :  { %5 = vst [vmem:[%s23_s1] sm:$0xf] %v4_v0 }

// kernel: tile.59
= control target key start
LH: loop header
LB: loop body
LE: loop exit
PB: predicated region body
PF: predicated region fallthrough
CT: control target
= control target key end

     0   :  { %vm7_vm0 = vcmask 261120   ;;  %s37_s8 = smov 32   ;;  %s38_s9 = smov 64   ;;  %vm13_vm1 = vcmask 1048320   ;;  %vm19_vm2 = vcmask 785920   ;;  %vm25_vm3 = vcmask 523520   ;;  %s55_s0 = inlined_call_operand.vmem [shape: f32[4,32], index: 0, kind: input, shape index: {}]   ;;  %s56_s1 = inlined_call_operand.vmem [shape: f32[1,128], index: 1, kind: output, shape index: {}]  }
   0x1   :  { %v4_v0 = vld [vmem:[%s55_s0] sm:$0xf]  ;;  %s36_s0 = smov 96  }
   0x2   :  { %5 = vst [vmem:[#allocation1] sm:$0xf] %v4_v0 }
   0x9   :  { %v10_v1 = vld [vmem:[#allocation1 + $0x3] sm:$0x1]   ;;  %v22_v2 = vld [vmem:[#allocation1 + $0x1] sm:$0x1]   ;;  %v6_v3 = vld [vmem:[#allocation1] sm:$0x1]  }
   0xa   :  { %11 = vrot.lane.b32.xlu0 %v10_v1, %s36_s0  ;;  %23 = vrot.lane.b32.xlu1 %v22_v2, %s37_s8  ;;  %v16_v4 = vld [vmem:[#allocation1 + $0x2] sm:$0x1]   ;;  %8 = vst.msk [vmem:[#allocation0] sm:$0x1] %vm7_vm0, %v6_v3  }
   0xe   :  { %17 = vrot.lane.b32.xlu0 %v16_v4, %s38_s9 }
  0x7c   :  { %v12_v5 = vpop.permute.xlu0 %11   ;;  %v24_v6 = vpop.permute.xlu1 %23  }
  0x7d   :  { %14 = vst.msk [vmem:[#allocation0] sm:$0x1] %vm13_vm1, %v12_v5  }
  0x80   :  { %v18_v7 = vpop.permute.xlu0 %17  }
  0x81   :  { %20 = vst.msk [vmem:[#allocation0] sm:$0x1] %vm19_vm2, %v18_v7  }
  0x82   :  { %26 = vst.msk [vmem:[#allocation0] sm:$0x1] %vm25_vm3, %v24_v6  }
  0x89   :  { %v30_v8 = vld [vmem:[#allocation0] sm:$0x1] }
  0x8a   :  { %32 = vst [vmem:[%s56_s1] sm:$0x1] %v30_v8 }

// kernel: dwconv_forward.3
= control target key start
LH: loop header
LB: loop body
LE: loop exit
PB: predicated region body
PF: predicated region fallthrough
CT: control target
= control target key end

     0   :  { %s1182_s12 = smov 0   ;;  %s1184_s13 = smov 0   ;;  %s1780_s0 = inlined_call_operand.vmem [shape: f32[2,16,512], index: 0, kind: input, shape index: {}]   ;;  %s1781_s1 = inlined_call_operand.vmem [shape: f32[3,3,512], index: 1, kind: input, shape index: {}]   ;;  %s1782_s2 = inlined_call_operand.vmem [shape: f32[1,512], index: 2, kind: input, shape index: {}]   ;;  %s1783_s3 = inlined_call_operand.vmem [shape: f32[2,16,512], index: 3, kind: output, shape index: {}]  }
   0x1   :  { %s1186_s14 = smov 0  }
   0x2 LB: > { %s25_s15 = sadd.s32 1, %s1154_s13  ;;  %p1101_p0 = scmp.ge.s32.totalorder %s1158_s14, 1  ;;  %s1158_s14 = sphi %s1186_s14, %s13_s14   ;;  %s1154_s13 = sphi %s1184_s13, %s1800_s13   ;;  %s1150_s12 = sphi %s1182_s12, %s1799_s12  }
   0x3   : > { %p27_p1 = scmp.ge.s32.totalorder %s25_s15, 2  ;;  %p159_p2 = scmp.lt.s32.totalorder %s1158_s14, 3 }
   0x5   : > { %s1802_s15 = smov (%p27_p1, %s25_s15), 0  ;;  %p160_p3 = pnand %p1101_p0, %p159_p2 }
   0x7   : > { %163 = sbr.rel (%p160_p3) target bundleno = 239 (0xef), region = 32 }
   0xe   : > { %p194_p4 = scmp.lt.s32.totalorder %s1150_s12, 1  ;;  %vm231_vm0 = vcmask 1040384   ;;  %s1160_s20 = smov 32   ;;  %vm256_vm1 = vcmask 1046528   ;;  %v326_v40 = vlaneseq  ;;  %v1392_v43 = vld [vmem:[%s1781_s1] sm:$0x77] }
   0xf   : > { %s1161_s21 = smov 96   ;;  %v1405_v47 = vld [vmem:[%s1781_s1 + $0x8] sm:$0x77]  ;;  %vm307_vm2 = vcmask 261120   ;;  %vm446_vm3 = vcmask 785408  }
  0x10   : > { %s1804_s12 = smov (!%p194_p4, %s1150_s12), 1  ;;  %v1384_v41 = vshrl.u32 %v326_v40, 7 }
  0x11   : > { %s1108_s16 = sshll.u32 %s1804_s12, 6 }
  0x12   : > { %s202_s19 = scalar_lea.vmem %s1780_s0, %s1108_s16  ;;  %1793 = vst [vmem:[#allocation6_spill] sm:$0xff] %v1384_v41  ;;  %v1387_v42 = vsub.s32 1, %v1384_v41  ;;  %v1395_v44 = vsub.s32 0, %v1384_v41  ;;  %v1400_v46 = vsub.s32 5, %v1384_v41  ;;  %v1410_v49 = vsub.s32 4, %v1384_v41  ;;  %s1731_s11 = scalar_lea.vmem %s1783_s3, %s1108_s16 }
  0x13   : > { %v1208_v0 = vld [vmem:[%s202_s19 + $0x10] sm:$0xff]  ;;  %v1210_v1 = vld [vmem:[%s202_s19] sm:$0xff]  ;;  %v1212_v2 = vld [vmem:[%s202_s19 + $0x18] sm:$0xff] }
  0x14   : > { %v234_v3 = vrot.slane %v1208_v0, 7  ;;  %v232_v4 = vrot.slane %v1210_v1, 7  ;;  %v235_v5 = vrot.slane %v1212_v2, 7  ;;  %v1217_v6 = vld [vmem:[%s202_s19 + $0x8] sm:$0xff]  ;;  %v1222_v9 = vld [vmem:[%s202_s19 + $0x20] sm:$0xff]  ;;  %v1242_v16 = vld [vmem:[%s202_s19 + $0x38] sm:$0xff]  ;;  %v381_v45 = vrot.slane %v1392_v43, %v1387_v42 }
  0x15   : > { %v233_v7 = vrot.slane %v1217_v6, 7  ;;  %v1220_v8 = vld [vmem:[%s202_s19 + $0x28] sm:$0xff]  ;;  %v236_v15 = vrot.slane %v1222_v9, 7  ;;  %v1244_v17 = vld [vmem:[%s202_s19 + $0x30] sm:$0xff]  ;;  %v242_v20 = vrot.slane %v1242_v16, 7  ;;  %v260_v24 = vrot.slane %v1217_v6, 1 }
  0x16   : > { %v1225_v10 = vsel %vm231_vm0, 0.0, %v234_v3  ;;  %v1228_v11 = vsel %vm231_vm0, 0.0, %v232_v4  ;;  %v1235_v12 = vsel %vm231_vm0, 0.0, %v235_v5  ;;  %v238_v14 = vrot.slane %v1220_v8, 7 }
  0x17   : > { %295 = vrot.lane.b32.xlu1 %v1225_v10, %s1160_s20  ;;  %291 = vrot.lane.b32.xlu0 %v1228_v11, %s1160_s20  ;;  %v1238_v13 = vsel %vm231_vm0, 0.0, %v233_v7  ;;  %v1254_v19 = vsel %vm231_vm0, %v232_v4, %v236_v15  ;;  %v240_v21 = vrot.slane %v1244_v17, 7  ;;  %v1263_v22 = vsel %vm231_vm0, %v235_v5, %v242_v20 }
  0x18   : > { %v1251_v18 = vsel %vm231_vm0, %v233_v7, %v238_v14  ;;  %v261_v25 = vrot.slane %v1220_v8, 1  ;;  %v257_v26 = vrot.slane %v1210_v1, 1  ;;  %v258_v27 = vrot.slane %v1222_v9, 1 }
  0x19   : > { %v1266_v23 = vsel %vm231_vm0, %v234_v3, %v240_v21  ;;  %v266_v29 = vrot.slane %v1212_v2, 1  ;;  %v267_v31 = vrot.slane %v1242_v16, 1  ;;  %v263_v32 = vrot.slane %v1208_v0, 1 }
  0x1a   : > { %v1325_v28 = vsel %vm256_vm1, %v260_v24, %v261_v25  ;;  %v1329_v30 = vsel %vm256_vm1, %v257_v26, %v258_v27  ;;  %v264_v33 = vrot.slane %v1244_v17, 1  ;;  %v1349_v36 = vsel %vm256_vm1, %v261_v25, 0.0 }
  0x1b   : > { %297 = vrot.lane.b32.xlu1 %v1235_v12, %s1160_s20  ;;  %293 = vrot.lane.b32.xlu0 %v1238_v13, %s1160_s20  ;;  %v1339_v34 = vsel %vm256_vm1, %v266_v29, %v267_v31  ;;  %1790 = vst [vmem:[#allocation3_spill] sm:$0xff] %v1349_v36  ;;  %v1352_v37 = vsel %vm256_vm1, %v258_v27, 0.0  ;;  %v1359_v38 = vsel %vm256_vm1, %v267_v31, 0.0  ;;  %v329_v48 = vrot.slane %v1392_v43, %v1395_v44 }
  0x1c   : > { %v1342_v35 = vsel %vm256_vm1, %v263_v32, %v264_v33  ;;  %1791 = vst [vmem:[#allocation4_spill] sm:$0xff] %v1359_v38  ;;  %v1362_v39 = vsel %vm256_vm1, %v264_v33, 0.0  ;;  %v389_v50 = vrot.slane %v1405_v47, %v1387_v42  ;;  %v401_v51 = vrot.slane %v381_v45, %v1387_v42 }
  0x1d   : > { %1789 = vst [vmem:[#allocation2_spill] sm:$0xff] %v1342_v35  ;;  %1792 = vst [vmem:[#allocation5_spill] sm:$0xff] %v1362_v39  ;;  %v393_v52 = vrot.slane %v1405_v47, %v1400_v46  ;;  %v385_v53 = vrot.slane %v1392_v43, %v1400_v46  ;;  %v349_v54 = vrot.slane %v329_v48, %v1395_v44 }
  0x1e   : > { %v341_v55 = vrot.slane %v1405_v47, %v1410_v49  ;;  %v333_v56 = vrot.slane %v1392_v43, %v1410_v49  ;;  %v337_v57 = vrot.slane %v1405_v47, %v1395_v44  ;;  %v409_v58 = vrot.slane %v389_v50, %v1387_v42 }
  0x1f   : > { %301 = vrot.lane.b32.xlu1 %v1251_v18, %s1160_s20  ;;  %299 = vrot.lane.b32.xlu0 %v1254_v19, %s1160_s20  ;;  %v414_v59 = vmul.f32 %v401_v51, %v1228_v11  ;;  %v413_v60 = vrot.slane %v393_v52, %v1387_v42  ;;  %v405_v61 = vrot.slane %v385_v53, %v1387_v42 }
  0x20   : > { %v361_v5 = vrot.slane %v341_v55, %v1395_v44  ;;  %v353_v7 = vrot.slane %v333_v56, %v1395_v44  ;;  %v357_v14 = vrot.slane %v337_v57, %v1395_v44  ;;  %v416_v15 = vmul.f32 %v409_v58, %v1225_v10 }
  0x21   : > { %v417_v20 = vmul.f32 %v413_v60, %v1235_v12  ;;  %v419_v40 = vmul.f32 %v405_v61, %v1251_v18  ;;  %v421_v57 = vmul.f32 %v413_v60, %v1263_v22 }
  0x23   : > { %305 = vrot.lane.b32.xlu1 %v1263_v22, %s1160_s20  ;;  %303 = vrot.lane.b32.xlu0 %v1266_v23, %s1160_s20 }
  0x27   : > { %432 = vrot.lane.b32.xlu1 %v1238_v13, %s1161_s21  ;;  %430 = vrot.lane.b32.xlu0 %v1228_v11, %s1161_s21  ;;  %v415_v11 = vmul.f32 %v405_v61, %v1238_v13 }
  0x2b   : > { %436 = vrot.lane.b32.xlu1 %v1235_v12, %s1161_s21  ;;  %434 = vrot.lane.b32.xlu0 %v1225_v10, %s1161_s21  ;;  %v418_v10 = vmul.f32 %v401_v51, %v1254_v19 }
  0x2f   : > { %440 = vrot.lane.b32.xlu1 %v1251_v18, %s1161_s21  ;;  %438 = vrot.lane.b32.xlu0 %v1254_v19, %s1161_s21  ;;  %v420_v18 = vmul.f32 %v409_v58, %v1266_v23  ;;  %v1468_v58 = vsub.s32 6, %v1384_v41 }
  0x33   : > { %444 = vrot.lane.b32.xlu1 %v1263_v22, %s1161_s21  ;;  %442 = vrot.lane.b32.xlu0 %v1266_v23, %s1161_s21  ;;  %v1465_v23 = vsub.s32 2, %v1384_v41 }
  0x37   : > { %517 = vrot.lane.b32.xlu1 %v1217_v6, %s1160_s20  ;;  %515 = vrot.lane.b32.xlu0 %v1210_v1, %s1160_s20 }
  0x3b   : > { %521 = vrot.lane.b32.xlu1 %v1212_v2, %s1160_s20  ;;  %519 = vrot.lane.b32.xlu0 %v1208_v0, %s1160_s20 }
  0x3f   : > { %525 = vrot.lane.b32.xlu1 %v1220_v8, %s1160_s20  ;;  %523 = vrot.lane.b32.xlu0 %v1222_v9, %s1160_s20 }
  0x43   : > { %529 = vrot.lane.b32.xlu1 %v1242_v16, %s1160_s20  ;;  %527 = vrot.lane.b32.xlu0 %v1244_v17, %s1160_s20 }
  0x47   : > { %655 = vrot.lane.b32.xlu1 %v1217_v6, %s1161_s21  ;;  %653 = vrot.lane.b32.xlu0 %v1210_v1, %s1161_s21 }
  0x4b   : > { %659 = vrot.lane.b32.xlu1 %v1212_v2, %s1161_s21  ;;  %657 = vrot.lane.b32.xlu0 %v1208_v0, %s1161_s21 }
  0x4f   : > { %663 = vrot.lane.b32.xlu1 %v1220_v8, %s1161_s21  ;;  %661 = vrot.lane.b32.xlu0 %v1222_v9, %s1161_s21 }
  0x53   : > { %667 = vrot.lane.b32.xlu1 %v1242_v16, %s1161_s21  ;;  %665 = vrot.lane.b32.xlu0 %v1244_v17, %s1161_s21 }
  0x57   : > { %743 = vrot.lane.b32.xlu1 %v1325_v28, %s1160_s20  ;;  %741 = vrot.lane.b32.xlu0 %v1329_v30, %s1160_s20 }
  0x5b   : > { %747 = vrot.lane.b32.xlu1 %v1339_v34, %s1160_s20  ;;  %745 = vrot.lane.b32.xlu0 %v1342_v35, %s1160_s20 }
  0x5f   : > { %751 = vrot.lane.b32.xlu1 %v1349_v36, %s1160_s20  ;;  %749 = vrot.lane.b32.xlu0 %v1352_v37, %s1160_s20 }
  0x63   : > { %755 = vrot.lane.b32.xlu1 %v1359_v38, %s1160_s20  ;;  %753 = vrot.lane.b32.xlu0 %v1362_v39, %s1160_s20 }
  0x67   : > { %881 = vrot.lane.b32.xlu1 %v1325_v28, %s1161_s21  ;;  %879 = vrot.lane.b32.xlu0 %v1329_v30, %s1161_s21 }
  0x6b   : > { %885 = vrot.lane.b32.xlu1 %v1339_v34, %s1161_s21  ;;  %883 = vrot.lane.b32.xlu0 %v1342_v35, %s1161_s21 }
  0x6f   : > { %889 = vrot.lane.b32.xlu1 %v1349_v36, %s1161_s21  ;;  %887 = vrot.lane.b32.xlu0 %v1352_v37, %s1161_s21 }
  0x73   : > { %893 = vrot.lane.b32.xlu1 %v1359_v38, %s1161_s21  ;;  %891 = vrot.lane.b32.xlu0 %v1362_v39, %s1161_s21 }
  0x89   : > { %v296_v62 = vpop.permute.xlu1 %295  ;;  %v292_v63 = vpop.permute.xlu0 %291 }
  0x8a   : > { %v322_v3 = vsel %vm307_vm2, 0.0, %v292_v63 }
  0x8b   : > { %v362_v4 = vmul.f32 %v349_v54, %v322_v3 }
  0x8d   : > { %v1437_v21 = vadd.f32 %v414_v59, %v362_v4  ;;  %v298_v24 = vpop.permute.xlu1 %297  ;;  %v294_v25 = vpop.permute.xlu0 %293 }
  0x8e   : > { %v310_v26 = vsel %vm307_vm2, %v296_v62, %v298_v24  ;;  %v308_v27 = vsel %vm307_vm2, %v292_v63, %v294_v25  ;;  %v309_v29 = vsel %vm307_vm2, %v294_v25, %v296_v62  ;;  %v470_v24 = vrot.slane %v1392_v43, %v1468_v58  ;;  %v1481_v25 = vld [vmem:[%s1781_s1 + $0x10] sm:$0x77] }
  0x8f   : > { %v365_v31 = vmul.f32 %v361_v5, %v310_v26  ;;  %v363_v32 = vmul.f32 %v353_v7, %v308_v27  ;;  %v364_v33 = vmul.f32 %v357_v14, %v309_v29  ;;  %v1486_v26 = vld [vmem:[%s1781_s1 + $0x18] sm:$0x77] }
  0x91   : > { %v1444_v12 = vadd.f32 %v417_v20, %v365_v31  ;;  %v1446_v13 = vadd.f32 %v415_v11, %v363_v32  ;;  %v1448_v45 = vadd.f32 %v416_v15, %v364_v33  ;;  %v302_v48 = vpop.permute.xlu1 %301  ;;  %v300_v50 = vpop.permute.xlu0 %299  ;;  %v466_v11 = vrot.slane %v1392_v43, %v1465_v23 }
  0x92   : > { %v311_v52 = vsel %vm307_vm2, %v300_v50, %v302_v48  ;;  %v323_v53 = vsel %vm307_vm2, 0.0, %v300_v50  ;;  %v604_v31 = vrot.slane %v1481_v25, %v1387_v42  ;;  %v552_v33 = vrot.slane %v1481_v25, %v1395_v44 }
  0x93   : > { %v366_v55 = vmul.f32 %v349_v54, %v323_v53  ;;  %v367_v56 = vmul.f32 %v353_v7, %v311_v52  ;;  %v486_v43 = vrot.slane %v466_v11, %v1465_v23  ;;  %v490_v50 = vrot.slane %v470_v24, %v1465_v23 }
  0x94   : > { %v560_v52 = vrot.slane %v1486_v26, %v1395_v44 }
  0x95   : > { %v1454_v59 = vadd.f32 %v418_v10, %v366_v55  ;;  %v1456_v19 = vadd.f32 %v419_v40, %v367_v56  ;;  %v306_v51 = vpop.permute.xlu1 %305  ;;  %v304_v61 = vpop.permute.xlu0 %303  ;;  %v556_v40 = vrot.slane %v1481_v25, %v1410_v49  ;;  %v564_v55 = vrot.slane %v1486_v26, %v1410_v49 }
  0x96   : > { %v312_v62 = vsel %vm307_vm2, %v302_v48, %v304_v61  ;;  %v313_v63 = vsel %vm307_vm2, %v304_v61, %v306_v51  ;;  %v616_v56 = vrot.slane %v1486_v26, %v1400_v46  ;;  %v580_v38 = vrot.slane %v560_v52, %v1395_v44 }
  0x97   : > { %v368_v3 = vmul.f32 %v357_v14, %v312_v62  ;;  %v369_v4 = vmul.f32 %v361_v5, %v313_v63  ;;  %v474_v5 = vrot.slane %v1405_v47, %v1465_v23  ;;  %v478_v14 = vrot.slane %v1405_v47, %v1468_v58 }
  0x98   : > { %v608_v47 = vrot.slane %v1481_v25, %v1400_v46  ;;  %v624_v63 = vrot.slane %v604_v31, %v1387_v42  ;;  %v576_v11 = vrot.slane %v556_v40, %v1395_v44  ;;  %v636_v24 = vrot.slane %v616_v56, %v1387_v42 }
  0x99   : > { %v1460_v15 = vadd.f32 %v420_v18, %v368_v3  ;;  %v1462_v54 = vadd.f32 %v421_v57, %v369_v4  ;;  %v433_v7 = vpop.permute.xlu1 %432  ;;  %v431_v22 = vpop.permute.xlu0 %430  ;;  %v1494_v32 = vrot.slane %v474_v5, %v1465_v23  ;;  %v498_v48 = vrot.slane %v478_v14, %v1465_v23 }
  0x9a   : > { %v447_v10 = vsel %vm446_vm3, %v431_v22, %v433_v7  ;;  %v612_v57 = vrot.slane %v1486_v26, %v1387_v42  ;;  %v628_v3 = vrot.slane %v608_v47, %v1387_v42  ;;  %v572_v22 = vrot.slane %v552_v33, %v1395_v44 }
  0x9b   : > { %v499_v4 = vmul.f32 %v486_v43, %v447_v10  ;;  %v584_v31 = vrot.slane %v564_v55, %v1395_v44  ;;  %v637_v47 = vmul.f32 %v624_v63, %v1210_v1 }
  0x9c   : > { %v632_v39 = vrot.slane %v612_v57, %v1387_v42  ;;  %v638_v10 = vmul.f32 %v628_v3, %v1217_v6  ;;  %v640_v6 = vmul.f32 %v636_v24, %v1212_v2 }
  0x9d   : > { %v437_v60 = vpop.permute.xlu1 %436  ;;  %v435_v20 = vpop.permute.xlu0 %434  ;;  %v507_v33 = vadd.f32 %v499_v4, %v1437_v21 }
  0x9e   : > { %v448_v53 = vsel %vm446_vm3, %v433_v7, %v435_v20  ;;  %v461_v18 = vsel %vm446_vm3, %v437_v60, 0.0  ;;  %v449_v51 = vsel %vm446_vm3, %v435_v20, %v437_v60  ;;  %v639_v21 = vmul.f32 %v632_v39, %v1208_v0 }
  0x9f   : > { %v500_v7 = vmul.f32 %v490_v50, %v448_v53  ;;  %v502_v5 = vmul.f32 %v498_v48, %v461_v18  ;;  %v501_v14 = vmul.f32 %v1494_v32, %v449_v51  ;;  %v641_v0 = vmul.f32 %v624_v63, %v1222_v9 }
  0xa1   : > { %v441_v27 = vpop.permute.xlu1 %440  ;;  %v439_v29 = vpop.permute.xlu0 %438  ;;  %v508_v57 = vadd.f32 %v500_v7, %v1446_v13  ;;  %v510_v55 = vadd.f32 %v502_v5, %v1444_v12  ;;  %v509_v1 = vadd.f32 %v501_v14, %v1448_v45 }
  0xa2   : > { %v450_v40 = vsel %vm446_vm3, %v439_v29, %v441_v27 }
  0xa3   : > { %v503_v4 = vmul.f32 %v486_v43, %v450_v40  ;;  %v642_v43 = vmul.f32 %v628_v3, %v1220_v8 }
  0xa5   : > { %v445_v61 = vpop.permute.xlu1 %444  ;;  %v443_v62 = vpop.permute.xlu0 %442 }
  0xa6   : > { %v451_v18 = vsel %vm446_vm3, %v441_v27, %v443_v62  ;;  %v462_v29 = vsel %vm446_vm3, %v445_v61, 0.0  ;;  %v452_v13 = vsel %vm446_vm3, %v443_v62, %v445_v61 }
  0xa7   : > { %v504_v27 = vmul.f32 %v490_v50, %v451_v18  ;;  %v506_v40 = vmul.f32 %v498_v48, %v462_v29 }
  0xa9   : > { %v518_v60 = vpop.permute.xlu1 %517  ;;  %v516_v20 = vpop.permute.xlu0 %515 }
  0xaa   : > { %v531_v53 = vsel %vm307_vm2, %v516_v20, %v518_v60  ;;  %v545_v56 = vsel %vm307_vm2, 0.0, %v516_v20 }
  0xab   : > { %v585_v51 = vmul.f32 %v572_v22, %v545_v56  ;;  %v586_v52 = vmul.f32 %v576_v11, %v531_v53  ;;  %v644_v56 = vmul.f32 %v636_v24, %v1242_v16 }
  0xad   : > { %v593_v36 = vadd.f32 %v585_v51, %v507_v33  ;;  %v594_v41 = vadd.f32 %v586_v52, %v508_v57  ;;  %v522_v20 = vpop.permute.xlu1 %521  ;;  %v520_v35 = vpop.permute.xlu0 %519  ;;  %v511_v33 = vadd.f32 %v503_v4, %v1454_v59 }
  0xae   : > { %v532_v7 = vsel %vm307_vm2, %v518_v60, %v520_v35  ;;  %v533_v12 = vsel %vm307_vm2, %v520_v35, %v522_v20  ;;  %v505_v60 = vmul.f32 %v1494_v32, %v452_v13  ;;  %v512_v35 = vadd.f32 %v504_v27, %v1456_v19  ;;  %v1582_v20 = vld [vmem:[%s1781_s1 + $0x28] sm:$0x77] }
  0xaf   : > { %v587_v5 = vmul.f32 %v580_v38, %v532_v7  ;;  %v588_v45 = vmul.f32 %v584_v31, %v533_v12  ;;  %v1539_v14 = vadd.f32 %v637_v47, %v593_v36  ;;  %v1541_v2 = vadd.f32 %v638_v10, %v594_v41 }
  0xb0   : > { %v643_v32 = vmul.f32 %v632_v39, %v1244_v17  ;;  %v514_v19 = vadd.f32 %v506_v40, %v1462_v54  ;;  %v513_v57 = vadd.f32 %v505_v60, %v1460_v15  ;;  %v842_v13 = vrot.slane %v1582_v20, %v1400_v46 }
  0xb1   : > { %v595_v53 = vadd.f32 %v587_v5, %v509_v1  ;;  %v596_v61 = vadd.f32 %v588_v45, %v510_v55  ;;  %v526_v50 = vpop.permute.xlu1 %525  ;;  %v524_v62 = vpop.permute.xlu0 %523  ;;  %v838_v27 = vrot.slane %v1582_v20, %v1387_v42  ;;  %v692_v40 = vrot.slane %v1481_v25, %v1468_v58 }
  0xb2   : > { %v534_v36 = vsel %vm307_vm2, %v524_v62, %v526_v50  ;;  %v546_v41 = vsel %vm307_vm2, 0.0, %v524_v62 }
  0xb3   : > { %v589_v47 = vmul.f32 %v572_v22, %v546_v41  ;;  %v590_v10 = vmul.f32 %v576_v11, %v534_v36  ;;  %v1550_v9 = vadd.f32 %v640_v6, %v596_v61  ;;  %v1552_v8 = vadd.f32 %v639_v21, %v595_v53 }
  0xb4   : > { %v696_v53 = vrot.slane %v1486_v26, %v1465_v23  ;;  %v790_v36 = vrot.slane %v1582_v20, %v1410_v49 }
  0xb5   : > { %v597_v59 = vadd.f32 %v589_v47, %v511_v33  ;;  %v598_v48 = vadd.f32 %v590_v10, %v512_v35  ;;  %v530_v63 = vpop.permute.xlu1 %529  ;;  %v528_v3 = vpop.permute.xlu0 %527  ;;  %v700_v33 = vrot.slane %v1486_v26, %v1468_v58  ;;  %v786_v35 = vrot.slane %v1582_v20, %v1395_v44 }
  0xb6   : > { %v535_v18 = vsel %vm307_vm2, %v526_v50, %v528_v3  ;;  %v536_v22 = vsel %vm307_vm2, %v528_v3, %v530_v63 }
  0xb7   : > { %v591_v11 = vmul.f32 %v580_v38, %v535_v18  ;;  %v592_v51 = vmul.f32 %v584_v31, %v536_v22  ;;  %v1560_v52 = vadd.f32 %v641_v0, %v597_v59  ;;  %v1562_v55 = vadd.f32 %v642_v43, %v598_v48  ;;  %v1573_v38 = vld [vmem:[%s1781_s1 + $0x20] sm:$0x77] }
  0xb8   : > { %v834_v31 = vrot.slane %v1573_v38, %v1400_v46  ;;  %v830_v29 = vrot.slane %v1573_v38, %v1387_v42  ;;  %v1597_v0 = vrot.slane %v842_v13, %v1387_v42  ;;  %v1600_v43 = vrot.slane %v838_v27, %v1387_v42  ;;  %v1794_v59 = vld [vmem:[#allocation2_spill] sm:$0xff] }
  0xb9   : > { %v599_v1 = vadd.f32 %v591_v11, %v513_v57  ;;  %v600_v6 = vadd.f32 %v592_v51, %v514_v19  ;;  %v656_v21 = vpop.permute.xlu1 %655  ;;  %v654_v16 = vpop.permute.xlu0 %653  ;;  %v688_v46 = vrot.slane %v1481_v25, %v1465_v23  ;;  %v778_v50 = vrot.slane %v1573_v38, %v1395_v44 }
  0xba   : > { %v1593_v5 = vrot.slane %v834_v31, %v1387_v42  ;;  %v850_v45 = vrot.slane %v830_v29, %v1387_v42  ;;  %v782_v62 = vrot.slane %v1573_v38, %v1410_v49  ;;  %v914_v47 = vrot.slane %v1573_v38, %v1465_v23 }
  0xbb   : > { %v1564_v24 = vadd.f32 %v644_v56, %v600_v6  ;;  %v1566_v17 = vadd.f32 %v643_v32, %v599_v1  ;;  %v1632_v10 = vmul.f32 %v1597_v0, %v1339_v34  ;;  %v1636_v49 = vmul.f32 %v1600_v43, %v1794_v59  ;;  %v963_v32 = vld [vmem:[%s1782_s2] sm:$0xf] }
  0xbc   : > { %v1620_v25 = vmul.f32 %v1593_v5, %v1325_v28  ;;  %v1623_v26 = vmul.f32 %v850_v45, %v1329_v30  ;;  %v1626_v41 = vmul.f32 %v850_v45, %v1352_v37  ;;  %v708_v28 = vrot.slane %v688_v46, %v1465_v23 }
  0xbd   : > { %v660_v39 = vpop.permute.xlu1 %659  ;;  %v658_v15 = vpop.permute.xlu0 %657  ;;  %v720_v48 = vrot.slane %v700_v33, %v1465_v23  ;;  %v712_v30 = vrot.slane %v692_v40, %v1465_v23  ;;  %v716_v37 = vrot.slane %v696_v53, %v1465_v23  ;;  %v798_v63 = vrot.slane %v778_v50, %v1395_v44  ;;  %v1795_v40 = vld [vmem:[#allocation6_spill] sm:$0xff] }
  0xbe   : > { %v1644_v3 = vrot.slane %v782_v62, %v1395_v44  ;;  %v669_v19 = vsel %vm446_vm3, %v654_v16, %v656_v21  ;;  %v1651_v57 = vrot.slane %v786_v35, %v1395_v44  ;;  %v1654_v18 = vrot.slane %v790_v36, %v1395_v44 }
  0xbf   : > { %v926_v22 = vrot.slane %v1582_v20, %v1468_v58  ;;  %v683_v11 = vsel %vm446_vm3, %v660_v39, 0.0  ;;  %v670_v51 = vsel %vm446_vm3, %v656_v21, %v658_v15  ;;  %v1661_v1 = vrot.slane %v914_v47, %v1465_v23 }
  0xc0   : > { %v918_v6 = vrot.slane %v1573_v38, %v1468_v58  ;;  %v671_v16 = vsel %vm446_vm3, %v658_v15, %v660_v39  ;;  %v1668_v29 = vrot.slane %v963_v32, %v1395_v44  ;;  %v922_v13 = vrot.slane %v1582_v20, %v1465_v23 }
  0xc1   : > { %v1568_v54 = vpop.permute.xlu1 %663  ;;  %v662_v4 = vpop.permute.xlu0 %661  ;;  %v721_v27 = vmul.f32 %v708_v28, %v669_v19  ;;  %v979_v53 = vsub.s32 3, %v1795_v40  ;;  %v724_v58 = vmul.f32 %v720_v48, %v683_v11  ;;  %v722_v38 = vmul.f32 %v712_v30, %v670_v51 }
  0xc2   : > { %v1677_v15 = vrot.slane %v926_v22, %v1465_v23  ;;  %v723_v44 = vmul.f32 %v716_v37, %v671_v16  ;;  %v672_v20 = vsel %vm446_vm3, %v662_v4, %v1568_v54  ;;  %v1682_v62 = vrot.slane %v918_v6, %v1465_v23 }
  0xc3   : > { %v729_v47 = vadd.f32 %v721_v27, %v1539_v14  ;;  %v1696_v19 = vrot.slane %v963_v32, %v979_v53  ;;  %v732_v22 = vadd.f32 %v724_v58, %v1550_v9  ;;  %v730_v11 = vadd.f32 %v722_v38, %v1541_v2 }
  0xc4   : > { %v725_v51 = vmul.f32 %v708_v28, %v672_v20  ;;  %v731_v16 = vadd.f32 %v723_v44, %v1552_v8  ;;  %v1710_v8 = vrot.slane %v963_v32, %v1465_v23 }
  0xc5   : > { %v1588_v7 = vpop.permute.xlu1 %667  ;;  %v1590_v12 = vpop.permute.xlu0 %665 }
  0xc6   : > { %v673_v4 = vsel %vm446_vm3, %v1568_v54, %v1590_v12  ;;  %v674_v54 = vsel %vm446_vm3, %v1590_v12, %v1588_v7 }
  0xc7   : > { %v727_v58 = vmul.f32 %v716_v37, %v674_v54 }
  0xc9   : > { %v744_v61 = vpop.permute.xlu1 %743  ;;  %v742_v60 = vpop.permute.xlu0 %741 }
  0xca   : > { %v771_v31 = vsel %vm307_vm2, 0.0, %v742_v60  ;;  %v757_v45 = vsel %vm307_vm2, %v742_v60, %v744_v61  ;;  %v684_v60 = vsel %vm446_vm3, %v1588_v7, 0.0 }
  0xcb   : > { %v811_v50 = vmul.f32 %v798_v63, %v771_v31  ;;  %v812_v35 = vmul.f32 %v1644_v3, %v757_v45  ;;  %v728_v14 = vmul.f32 %v720_v48, %v684_v60  ;;  %v733_v48 = vadd.f32 %v725_v51, %v1560_v52 }
  0xcd   : > { %v748_v56 = vpop.permute.xlu1 %747  ;;  %v746_v34 = vpop.permute.xlu0 %745  ;;  %v819_v31 = vadd.f32 %v811_v50, %v729_v47  ;;  %v820_v27 = vadd.f32 %v812_v35, %v730_v11  ;;  %v1796_v50 = vld [vmem:[#allocation3_spill] sm:$0xff]  ;;  %v1797_v35 = vld [vmem:[#allocation4_spill] sm:$0xff]  ;;  %v735_v47 = vadd.f32 %v727_v58, %v1566_v17 }
  0xce   : > { %v759_v21 = vsel %vm307_vm2, %v746_v34, %v748_v56  ;;  %v758_v39 = vsel %vm307_vm2, %v744_v61, %v746_v34  ;;  %v1689_v61 = vrot.slane %v922_v13, %v1465_v23  ;;  %v726_v13 = vmul.f32 %v712_v30, %v673_v4 }
  0xcf   : > { %v814_v36 = vmul.f32 %v1654_v18, %v759_v21  ;;  %v813_v59 = vmul.f32 %v1651_v57, %v758_v39  ;;  %v1706_v21 = vrot.slane %v963_v32, %v1387_v42  ;;  %v736_v42 = vadd.f32 %v728_v14, %v1564_v24 }
  0xd0   : > { %v734_v38 = vadd.f32 %v726_v13, %v1562_v55  ;;  %v872_v37 = vadd.f32 %v1620_v25, %v820_v27  ;;  %v868_v60 = vmul.f32 %v1593_v5, %v1796_v50 }
  0xd1   : > { %v752_v46 = vpop.permute.xlu1 %751  ;;  %v750_v33 = vpop.permute.xlu0 %749  ;;  %v822_v45 = vadd.f32 %v814_v36, %v732_v22  ;;  %v821_v9 = vadd.f32 %v813_v59, %v731_v16  ;;  %v870_v36 = vmul.f32 %v1597_v0, %v1797_v35 }
  0xd2   : > { %v772_v6 = vsel %vm307_vm2, 0.0, %v750_v33  ;;  %v760_v2 = vsel %vm307_vm2, %v750_v33, %v752_v46  ;;  %v871_v33 = vadd.f32 %v1623_v26, %v819_v31 }
  0xd3   : > { %v815_v28 = vmul.f32 %v798_v63, %v772_v6  ;;  %v816_v23 = vmul.f32 %v1644_v3, %v760_v2  ;;  %v874_v52 = vadd.f32 %v1632_v10, %v822_v45  ;;  %v873_v24 = vadd.f32 %v1636_v49, %v821_v9  ;;  %v1798_v6 = vld [vmem:[#allocation5_spill] sm:$0xff] }
  0xd4   : > { %v869_v16 = vmul.f32 %v1600_v43, %v1798_v6 }
  0xd5   : > { %v756_v56 = vpop.permute.xlu1 %755  ;;  %v754_v34 = vpop.permute.xlu0 %753  ;;  %v823_v32 = vadd.f32 %v815_v28, %v733_v48  ;;  %v824_v4 = vadd.f32 %v816_v23, %v734_v38 }
  0xd6   : > { %v762_v7 = vsel %vm307_vm2, %v754_v34, %v756_v56  ;;  %v761_v30 = vsel %vm307_vm2, %v752_v46, %v754_v34 }
  0xd7   : > { %v818_v39 = vmul.f32 %v1654_v18, %v762_v7  ;;  %v817_v26 = vmul.f32 %v1651_v57, %v761_v30  ;;  %v875_v14 = vadd.f32 %v1626_v41, %v823_v32  ;;  %v876_v9 = vadd.f32 %v868_v60, %v824_v4 }
  0xd9   : > { %v882_v40 = vpop.permute.xlu1 %881  ;;  %v880_v53 = vpop.permute.xlu0 %879  ;;  %v826_v59 = vadd.f32 %v818_v39, %v736_v42  ;;  %v825_v5 = vadd.f32 %v817_v26, %v735_v47 }
  0xda   : > { %v895_v12 = vsel %vm446_vm3, %v880_v53, %v882_v40 }
  0xdb   : > { %v947_v63 = vmul.f32 %v1661_v1, %v895_v12  ;;  %v878_v43 = vadd.f32 %v870_v36, %v826_v59  ;;  %v877_v28 = vadd.f32 %v869_v16, %v825_v5 }
  0xdd   : > { %v955_v44 = vadd.f32 %v947_v63, %v871_v33  ;;  %v886_v20 = vpop.permute.xlu1 %885  ;;  %v884_v46 = vpop.permute.xlu0 %883 }
  0xde   : > { %v909_v55 = vsel %vm446_vm3, %v886_v20, 0.0  ;;  %v896_v25 = vsel %vm446_vm3, %v882_v40, %v884_v46  ;;  %v897_v10 = vsel %vm446_vm3, %v884_v46, %v886_v20 }
  0xdf   : > { %v985_v3 = vadd.f32 %v1668_v29, %v955_v44  ;;  %v950_v49 = vmul.f32 %v1677_v15, %v909_v55  ;;  %v948_v18 = vmul.f32 %v1682_v62, %v896_v25  ;;  %v949_v57 = vmul.f32 %v1689_v61, %v897_v10 }
  0xe1   : > { %993 = vst [vmem:[%s1731_s11] sm:$0xff] %v985_v3  ;;  %v958_v56 = vadd.f32 %v950_v49, %v874_v52  ;;  %v956_v34 = vadd.f32 %v948_v18, %v872_v37  ;;  %v957_v22 = vadd.f32 %v949_v57, %v873_v24  ;;  %v890_v11 = vpop.permute.xlu1 %889  ;;  %v888_v51 = vpop.permute.xlu0 %887 }
  0xe2   : > { %v898_v0 = vsel %vm446_vm3, %v888_v51, %v890_v11 }
  0xe3   : > { %v988_v17 = vadd.f32 %v1696_v19, %v958_v56  ;;  %v986_v54 = vadd.f32 %v1706_v21, %v956_v34  ;;  %v987_v31 = vadd.f32 %v1710_v8, %v957_v22  ;;  %v951_v13 = vmul.f32 %v1661_v1, %v898_v0 }
  0xe5   : > { %996 = vst [vmem:[%s1731_s11 + $0x18] sm:$0xff] %v988_v17  ;;  %994 = vst [vmem:[%s1731_s11 + $0x8] sm:$0xff] %v986_v54  ;;  %v959_v27 = vadd.f32 %v951_v13, %v875_v14  ;;  %v894_v45 = vpop.permute.xlu1 %893  ;;  %v892_v2 = vpop.permute.xlu0 %891 }
  0xe6   : > { %995 = vst [vmem:[%s1731_s11 + $0x10] sm:$0xff] %v987_v31  ;;  %v910_v41 = vsel %vm446_vm3, %v894_v45, 0.0  ;;  %v899_v40 = vsel %vm446_vm3, %v890_v11, %v892_v2  ;;  %v900_v53 = vsel %vm446_vm3, %v892_v2, %v894_v45 }
  0xe7   : > { %v989_v1 = vadd.f32 %v1668_v29, %v959_v27  ;;  %v954_v48 = vmul.f32 %v1677_v15, %v910_v41  ;;  %v952_v58 = vmul.f32 %v1682_v62, %v899_v40  ;;  %v953_v7 = vmul.f32 %v1689_v61, %v900_v53 }
  0xe9   : > { %997 = vst [vmem:[%s1731_s11 + $0x20] sm:$0xff] %v989_v1  ;;  %v962_v12 = vadd.f32 %v954_v48, %v878_v43  ;;  %v960_v42 = vadd.f32 %v952_v58, %v876_v9  ;;  %v961_v30 = vadd.f32 %v953_v7, %v877_v28 }
  0xeb   : > { %v992_v33 = vadd.f32 %v1696_v19, %v962_v12  ;;  %v990_v63 = vadd.f32 %v1706_v21, %v960_v42  ;;  %v991_v38 = vadd.f32 %v1710_v8, %v961_v30 }
  0xed   : > { %1000 = vst [vmem:[%s1731_s11 + $0x38] sm:$0xff] %v992_v33  ;;  %998 = vst [vmem:[%s1731_s11 + $0x28] sm:$0xff] %v990_v63 }
  0xee   : > { %999 = vst [vmem:[%s1731_s11 + $0x30] sm:$0xff] %v991_v38 }
  0xef PF: > { %s13_s14 = sadd.s32 1, %s1158_s14   ;;  %s1799_s12 = smov %s1154_s13 }
  0xf0   : > { %p10_p5 = scmp.ge.s32.totalorder %s13_s14, 4   ;;  %s1800_s13 = smov %s1802_s15 }
  0xf2   :  { %12 = sbr.rel (!%p10_p5) target bundleno = 2 (0x2), region = 62 }

// kernel: dwconv_forward.4
= control target key start
LH: loop header
LB: loop body
LE: loop exit
PB: predicated region body
PF: predicated region fallthrough
CT: control target
= control target key end

     0   :  { %s676_s12 = smov 0   ;;  %s678_s13 = smov 0   ;;  %s822_s0 = inlined_call_operand.vmem [shape: f32[2,8,256], index: 0, kind: input, shape index: {}]   ;;  %s823_s1 = inlined_call_operand.vmem [shape: f32[3,3,256], index: 1, kind: input, shape index: {}]   ;;  %s824_s2 = inlined_call_operand.vmem [shape: f32[1,256], index: 2, kind: input, shape index: {}]   ;;  %s825_s3 = inlined_call_operand.vmem [shape: f32[2,8,256], index: 3, kind: output, shape index: {}]  }
   0x1   :  { %s680_s14 = smov 0  }
   0x2 LB: > { %s25_s15 = sadd.s32 1, %s648_s13  ;;  %p595_p0 = scmp.ge.s32.totalorder %s652_s14, 1  ;;  %s652_s14 = sphi %s680_s14, %s13_s14   ;;  %s648_s13 = sphi %s678_s13, %s827_s13   ;;  %s644_s12 = sphi %s676_s12, %s826_s12  }
   0x3   : > { %p27_p1 = scmp.ge.s32.totalorder %s25_s15, 2  ;;  %p157_p2 = scmp.lt.s32.totalorder %s652_s14, 3 }
   0x5   : > { %s829_s15 = smov (%p27_p1, %s25_s15), 0  ;;  %p158_p3 = pnand %p595_p0, %p157_p2 }
   0x6   : > { %p189_p4 = scmp.lt.s32.totalorder (!%p158_p3), %s644_s12, 1  ;;  %vm215_vm0 = vcmask (!%p158_p3), 1040384   ;;  %s654_s20 = smov (!%p158_p3), 32   ;;  %vm222_vm1 = vcmask (!%p158_p3), 1046528   ;;  %v240_v10 = vlaneseq (!%p158_p3)  ;;  %v225_v14 = vld [vmem:[%s823_s1] sm:$0x77] (!%p158_p3) }
   0x7   : > { %161 = sbr.rel (%p158_p3) target bundleno = 164 (0xa4), region = 32  ;;  %s655_s21 = smov (!%p158_p3), 96   ;;  %vm234_vm2 = vcmask (!%p158_p3), 261120   ;;  %v226_v24 = vld [vmem:[%s823_s1 + $0x8] sm:$0x77] (!%p158_p3)  ;;  %vm288_vm3 = vcmask (!%p158_p3), 785408  }
   0x8   : > { %v241_v11 = vshrl.u32 (!%p158_p3), %v240_v10, 7  ;;  %v753_v32 = vld [vmem:[%s823_s1 + $0x10] sm:$0x77] (!%p158_p3) }
   0xa   : > { %v722_v12 = vsub.s32 (!%p158_p3), 1, %v241_v11  ;;  %v724_v13 = vsub.s32 (!%p158_p3), 0, %v241_v11  ;;  %v729_v15 = vsub.s32 (!%p158_p3), 5, %v241_v11  ;;  %v731_v16 = vsub.s32 (!%p158_p3), 4, %v241_v11 }
   0xb   : > { %v735_v19 = vsub.s32 (!%p158_p3), 2, %v241_v11  ;;  %v737_v20 = vsub.s32 (!%p158_p3), 6, %v241_v11 }
   0xc   : > { %v265_v17 = vrot.slane (!%p158_p3), %v225_v14, %v722_v12  ;;  %v243_v18 = vrot.slane (!%p158_p3), %v225_v14, %v724_v13  ;;  %v269_v21 = vrot.slane (!%p158_p3), %v225_v14, %v729_v15  ;;  %v247_v23 = vrot.slane (!%p158_p3), %v225_v14, %v731_v16 }
   0xd   : > { %v296_v27 = vrot.slane (!%p158_p3), %v225_v14, %v735_v19  ;;  %v300_v28 = vrot.slane (!%p158_p3), %v225_v14, %v737_v20  ;;  %v353_v31 = vrot.slane (!%p158_p3), %v226_v24, %v729_v15  ;;  %v327_v35 = vrot.slane (!%p158_p3), %v226_v24, %v724_v13 }
   0xe   : > { %s831_s12 = smov (!%p189_p4, %s644_s12), 1  ;;  %v275_v25 = vrot.slane %v265_v17, %v722_v12  ;;  %v253_v26 = vrot.slane %v243_v18, %v724_v13  ;;  %v279_v29 = vrot.slane %v269_v21, %v722_v12  ;;  %v331_v36 = vrot.slane %v226_v24, %v731_v16 }
   0xf   : > { %s602_s16 = sshll.u32 %s831_s12, 4  ;;  %v349_v37 = vrot.slane %v226_v24, %v722_v12  ;;  %v438_v38 = vrot.slane %v753_v32, %v729_v15  ;;  %v257_v39 = vrot.slane %v247_v23, %v724_v13  ;;  %v383_v40 = vrot.slane %v226_v24, %v737_v20 }
  0x10   : > { %s197_s19 = scalar_lea.vmem %s822_s0, %s602_s16  ;;  %v306_v43 = vrot.slane %v296_v27, %v735_v19  ;;  %v310_v44 = vrot.slane %v300_v28, %v735_v19  ;;  %v434_v46 = vrot.slane %v753_v32, %v722_v12  ;;  %v363_v48 = vrot.slane %v353_v31, %v722_v12  ;;  %s206_s5 = scalar_lea.vmem %s825_s3, %s602_s16 }
  0x11   : > { %v702_v0 = vld [vmem:[%s197_s19 + $0x8] sm:$0xff]  ;;  %v704_v1 = vld [vmem:[%s197_s19] sm:$0xff]  ;;  %v379_v49 = vrot.slane %v226_v24, %v735_v19  ;;  %v337_v52 = vrot.slane %v327_v35, %v724_v13  ;;  %v341_v53 = vrot.slane %v331_v36, %v724_v13  ;;  %v359_v54 = vrot.slane %v349_v37, %v722_v12 }
  0x12   : > { %317 = vrot.lane.b32.xlu1 %v702_v0, %s654_s20  ;;  %v211_v2 = vrot.slane %v704_v1, 7  ;;  %v212_v3 = vrot.slane %v702_v0, 7  ;;  %v219_v6 = vrot.slane %v702_v0, 1  ;;  %v218_v7 = vrot.slane %v704_v1, 1 }
  0x13   : > { %v393_v58 = vrot.slane %v383_v40, %v735_v19  ;;  %v412_v62 = vrot.slane %v753_v32, %v724_v13  ;;  %v364_v14 = vmul.f32 %v359_v54, %v704_v1  ;;  %v444_v23 = vrot.slane %v434_v46, %v722_v12 }
  0x14   : > { %v216_v4 = vsel %vm215_vm0, 0.0, %v211_v2  ;;  %v217_v5 = vsel %vm215_vm0, 0.0, %v212_v3  ;;  %v713_v8 = vsel %vm222_vm1, %v219_v6, 0.0  ;;  %v717_v9 = vsel %vm222_vm1, %v218_v7, 0.0 }
  0x15   : > { %230 = vrot.lane.b32.xlu0 %v216_v4, %s654_s20  ;;  %v280_v41 = vmul.f32 %v275_v25, %v216_v4  ;;  %v281_v45 = vmul.f32 %v279_v29, %v217_v5  ;;  %v365_v3 = vmul.f32 %v363_v48, %v702_v0  ;;  %v464_v29 = vrot.slane %v753_v32, %v735_v19 }
  0x16   : > { %284 = vrot.lane.b32.xlu1 %v216_v4, %s655_s21  ;;  %v389_v4 = vrot.slane %v379_v49, %v735_v19  ;;  %v449_v36 = vmul.f32 %v444_v23, %v717_v9 }
  0x19   : > { %232 = vrot.lane.b32.xlu0 %v217_v5, %s654_s20 }
  0x1a   : > { %286 = vrot.lane.b32.xlu1 %v217_v5, %s655_s21  ;;  %v416_v5 = vrot.slane %v753_v32, %v731_v16 }
  0x1d   : > { %315 = vrot.lane.b32.xlu0 %v704_v1, %s654_s20 }
  0x1e   : > { %370 = vrot.lane.b32.xlu1 %v702_v0, %s655_s21  ;;  %v448_v0 = vrot.slane %v438_v38, %v722_v12 }
  0x20   : > { %v450_v35 = vmul.f32 %v448_v0, %v713_v8 }
  0x21   : > { %368 = vrot.lane.b32.xlu0 %v704_v1, %s655_s21  ;;  %v422_v1 = vrot.slane %v412_v62, %v724_v13 }
  0x22   : > { %402 = vrot.lane.b32.xlu1 %v713_v8, %s654_s20 }
  0x25   : > { %400 = vrot.lane.b32.xlu0 %v717_v9, %s654_s20 }
  0x26   : > { %455 = vrot.lane.b32.xlu1 %v713_v8, %s655_s21  ;;  %v483_v8 = vld [vmem:[%s824_s2] sm:$0x3] }
  0x27   : > { %v492_v49 = vrot.slane %v483_v8, %v722_v12 }
  0x29   : > { %453 = vrot.lane.b32.xlu0 %v717_v9, %s655_s21 }
  0x84   : > { %v318_v22 = vpop.permute.xlu1 %317 }
  0x87   : > { %v231_v30 = vpop.permute.xlu0 %230 }
  0x88   : > { %v238_v33 = vsel %vm234_vm2, 0.0, %v231_v30  ;;  %v285_v34 = vpop.permute.xlu1 %284 }
  0x89   : > { %v258_v42 = vmul.f32 %v253_v26, %v238_v33 }
  0x8b   : > { %v233_v47 = vpop.permute.xlu0 %232  ;;  %v282_v59 = vadd.f32 %v280_v41, %v258_v42 }
  0x8c   : > { %v235_v50 = vsel %vm234_vm2, %v231_v30, %v233_v47  ;;  %v287_v51 = vpop.permute.xlu1 %286 }
  0x8d   : > { %v259_v55 = vmul.f32 %v257_v39, %v235_v50  ;;  %v289_v56 = vsel %vm288_vm3, %v285_v34, %v287_v51  ;;  %v292_v57 = vsel %vm288_vm3, %v287_v51, 0.0  ;;  %v426_v34 = vrot.slane %v416_v5, %v724_v13 }
  0x8e   : > { %v311_v60 = vmul.f32 %v306_v43, %v289_v56  ;;  %v312_v61 = vmul.f32 %v310_v44, %v292_v57 }
  0x8f   : > { %v283_v63 = vadd.f32 %v281_v45, %v259_v55  ;;  %v316_v2 = vpop.permute.xlu0 %315 }
  0x90   : > { %v313_v6 = vadd.f32 %v311_v60, %v282_v59  ;;  %v319_v7 = vsel %vm234_vm2, %v316_v2, %v318_v22  ;;  %v322_v10 = vsel %vm234_vm2, 0.0, %v316_v2  ;;  %v371_v11 = vpop.permute.xlu1 %370  ;;  %v468_v22 = vrot.slane %v753_v32, %v737_v20 }
  0x91   : > { %v314_v15 = vadd.f32 %v312_v61, %v283_v63  ;;  %v342_v17 = vmul.f32 %v337_v52, %v322_v10  ;;  %v343_v18 = vmul.f32 %v341_v53, %v319_v7  ;;  %v375_v21 = vsel %vm288_vm3, %v371_v11, 0.0 }
  0x92   : > { %v395_v26 = vmul.f32 %v393_v58, %v375_v21  ;;  %v478_v20 = vrot.slane %v468_v22, %v735_v19  ;;  %v474_v32 = vrot.slane %v464_v29, %v735_v19  ;;  %v488_v19 = vrot.slane %v483_v8, %v724_v13 }
  0x93   : > { %v344_v24 = vadd.f32 %v342_v17, %v313_v6  ;;  %v345_v25 = vadd.f32 %v343_v18, %v314_v15  ;;  %v369_v16 = vpop.permute.xlu0 %368 }
  0x94   : > { %v372_v27 = vsel %vm288_vm3, %v369_v16, %v371_v11  ;;  %v403_v28 = vpop.permute.xlu1 %402 }
  0x95   : > { %v367_v30 = vadd.f32 %v365_v3, %v345_v25  ;;  %v366_v31 = vadd.f32 %v364_v14, %v344_v24  ;;  %v394_v33 = vmul.f32 %v389_v4, %v372_v27 }
  0x97   : > { %v401_v37 = vpop.permute.xlu0 %400  ;;  %v397_v38 = vadd.f32 %v395_v26, %v367_v30  ;;  %v396_v42 = vadd.f32 %v394_v33, %v366_v31 }
  0x98   : > { %v404_v39 = vsel %vm234_vm2, %v401_v37, %v403_v28  ;;  %v407_v40 = vsel %vm234_vm2, 0.0, %v401_v37  ;;  %v456_v41 = vpop.permute.xlu1 %455 }
  0x99   : > { %v427_v43 = vmul.f32 %v422_v1, %v407_v40  ;;  %v428_v44 = vmul.f32 %v426_v34, %v404_v39  ;;  %v460_v9 = vsel %vm288_vm3, %v456_v41, 0.0 }
  0x9a   : > { %v480_v47 = vmul.f32 %v478_v20, %v460_v9 }
  0x9b   : > { %v429_v45 = vadd.f32 %v427_v43, %v396_v42  ;;  %v430_v46 = vadd.f32 %v428_v44, %v397_v38  ;;  %v454_v48 = vpop.permute.xlu0 %453 }
  0x9c   : > { %v457_v50 = vsel %vm288_vm3, %v454_v48, %v456_v41 }
  0x9d   : > { %v452_v51 = vadd.f32 %v450_v35, %v430_v46  ;;  %v451_v52 = vadd.f32 %v449_v36, %v429_v45  ;;  %v479_v53 = vmul.f32 %v474_v32, %v457_v50 }
  0x9f   : > { %v482_v54 = vadd.f32 %v480_v47, %v452_v51  ;;  %v481_v55 = vadd.f32 %v479_v53, %v451_v52 }
  0xa1   : > { %v496_v56 = vadd.f32 %v492_v49, %v482_v54  ;;  %v495_v57 = vadd.f32 %v488_v19, %v481_v55 }
  0xa3   : > { %498 = vst [vmem:[%s206_s5 + $0x8] sm:$0xff] %v496_v56  ;;  %497 = vst [vmem:[%s206_s5] sm:$0xff] %v495_v57 }
  0xa4 PF: > { %s13_s14 = sadd.s32 1, %s652_s14   ;;  %s826_s12 = smov %s648_s13 }
  0xa5   : > { %p10_p5 = scmp.ge.s32.totalorder %s13_s14, 4   ;;  %s827_s13 = smov %s829_s15 }
  0xa7   :  { %12 = sbr.rel (!%p10_p5) target bundleno = 2 (0x2), region = 62 }

// kernel: dwconv_forward.5
= control target key start
LH: loop header
LB: loop body
LE: loop exit
PB: predicated region body
PF: predicated region fallthrough
CT: control target
= control target key end

     0   :  { %s457_s12 = smov 0   ;;  %s459_s13 = smov 0   ;;  %s515_s0 = inlined_call_operand.vmem [shape: f32[2,4,128], index: 0, kind: input, shape index: {}]   ;;  %s516_s1 = inlined_call_operand.vmem [shape: f32[3,3,128], index: 1, kind: input, shape index: {}]   ;;  %s517_s2 = inlined_call_operand.vmem [shape: f32[1,128], index: 2, kind: input, shape index: {}]   ;;  %s518_s3 = inlined_call_operand.vmem [shape: f32[2,4,128], index: 3, kind: output, shape index: {}]  }
   0x1   :  { %s461_s14 = smov 0  }
   0x2 LB: > { %s25_s15 = sadd.s32 1, %s429_s13  ;;  %p379_p0 = scmp.ge.s32.totalorder %s433_s14, 1  ;;  %s433_s14 = sphi %s461_s14, %s13_s14   ;;  %s429_s13 = sphi %s459_s13, %s520_s13   ;;  %s425_s12 = sphi %s457_s12, %s519_s12  }
   0x3   : > { %p27_p1 = scmp.ge.s32.totalorder %s25_s15, 2  ;;  %p155_p2 = scmp.lt.s32.totalorder %s433_s14, 3 }
   0x5   : > { %s522_s15 = smov (%p27_p1, %s25_s15), 0  ;;  %p156_p3 = pnand %p379_p0, %p155_p2 }
   0x6   : > { %p183_p4 = scmp.lt.s32.totalorder (!%p156_p3), %s425_s12, 1  ;;  %vm201_vm0 = vcmask (!%p156_p3), 1040384   ;;  %s435_s20 = smov (!%p156_p3), 32   ;;  %vm205_vm1 = vcmask (!%p156_p3), 1042432   ;;  %v216_v5 = vlaneseq (!%p156_p3)  ;;  %v207_v9 = vld [vmem:[%s516_s1] sm:$0x7] (!%p156_p3) }
   0x7   : > { %159 = sbr.rel (%p156_p3) target bundleno = 160 (0xa0), region = 32  ;;  %s436_s21 = smov (!%p156_p3), 96   ;;  %vm214_vm2 = vcmask (!%p156_p3), 261120   ;;  %v208_v14 = vld [vmem:[%s516_s1 + $0x4] sm:$0x7] (!%p156_p3)  ;;  %vm231_vm3 = vcmask (!%p156_p3), 785408  }
   0x8   : > { %v217_v6 = vshrl.u32 (!%p156_p3), %v216_v5, 7  ;;  %v209_v25 = vld [vmem:[%s516_s1 + $0x8] sm:$0x7] (!%p156_p3)  ;;  %v382_v50 = vld [vmem:[%s517_s2] ss:$0 sm:$0xff] (!%p156_p3) }
   0xa   : > { %v224_v7 = vsub.s32 (!%p156_p3), 1, %v217_v6  ;;  %v218_v8 = vsub.s32 (!%p156_p3), 0, %v217_v6  ;;  %v235_v12 = vsub.s32 (!%p156_p3), 2, %v217_v6 }
   0xc   : > { %v225_v10 = vrot.slane (!%p156_p3), %v207_v9, %v224_v7  ;;  %v219_v11 = vrot.slane (!%p156_p3), %v207_v9, %v218_v8  ;;  %v236_v19 = vrot.slane (!%p156_p3), %v207_v9, %v235_v12  ;;  %v246_v20 = vrot.slane (!%p156_p3), %v208_v14, %v218_v8 }
   0xd   : > { %v252_v23 = vrot.slane (!%p156_p3), %v208_v14, %v224_v7  ;;  %v262_v30 = vrot.slane (!%p156_p3), %v208_v14, %v235_v12  ;;  %v273_v34 = vrot.slane (!%p156_p3), %v209_v25, %v218_v8  ;;  %v279_v37 = vrot.slane (!%p156_p3), %v209_v25, %v224_v7 }
   0xe   : > { %s524_s12 = smov (!%p183_p4, %s425_s12), 1  ;;  %v289_v43 = vrot.slane %v209_v25, %v235_v12 }
   0xf   : > { %s380_s16 = sshll.u32 %s524_s12, 2 }
  0x10   : > { %s189_s19 = scalar_lea.vmem %s515_s0, %s380_s16  ;;  %s196_s5 = scalar_lea.vmem %s518_s3, %s380_s16 }
  0x11   : > { %v197_v0 = vld [vmem:[%s189_s19] sm:$0xf] }
  0x12   : > { %v199_v1 = vrot.slane %v197_v0, 7  ;;  %239 = vrot.lane.b32.xlu1 %v197_v0, %s435_s20  ;;  %v203_v3 = vrot.slane %v197_v0, 1  ;;  %v253_v33 = vmul.f32 %v252_v23, %v197_v0 }
  0x14   : > { %v202_v2 = vsel %vm201_vm0, 0.0, %v199_v1  ;;  %v206_v4 = vsel %vm205_vm1, %v203_v3, 0.0 }
  0x15   : > { %211 = vrot.lane.b32.xlu0 %v202_v2, %s435_s20  ;;  %v226_v17 = vmul.f32 %v225_v10, %v202_v2  ;;  %v280_v45 = vmul.f32 %v279_v37, %v206_v4 }
  0x16   : > { %255 = vrot.lane.b32.xlu1 %v197_v0, %s436_s21 }
  0x19   : > { %228 = vrot.lane.b32.xlu0 %v202_v2, %s436_s21 }
  0x1a   : > { %282 = vrot.lane.b32.xlu1 %v206_v4, %s436_s21 }
  0x1d   : > { %266 = vrot.lane.b32.xlu0 %v206_v4, %s435_s20 }
  0x84   : > { %v240_v13 = vpop.permute.xlu1 %239 }
  0x85   : > { %v242_v21 = vsel %vm214_vm2, 0.0, %v240_v13 }
  0x86   : > { %v247_v29 = vmul.f32 %v246_v20, %v242_v21 }
  0x87   : > { %v212_v15 = vpop.permute.xlu0 %211 }
  0x88   : > { %v215_v16 = vsel %vm214_vm2, 0.0, %v212_v15  ;;  %v256_v24 = vpop.permute.xlu1 %255 }
  0x89   : > { %v220_v18 = vmul.f32 %v219_v11, %v215_v16  ;;  %v258_v31 = vsel %vm231_vm3, %v256_v24, 0.0 }
  0x8a   : > { %v263_v39 = vmul.f32 %v262_v30, %v258_v31 }
  0x8b   : > { %v229_v22 = vpop.permute.xlu0 %228  ;;  %v227_v27 = vadd.f32 %v226_v17, %v220_v18 }
  0x8c   : > { %v232_v26 = vsel %vm231_vm3, %v229_v22, 0.0  ;;  %v283_v40 = vpop.permute.xlu1 %282 }
  0x8d   : > { %v237_v28 = vmul.f32 %v236_v19, %v232_v26  ;;  %v285_v44 = vsel %vm231_vm3, %v283_v40, 0.0 }
  0x8e   : > { %v290_v48 = vmul.f32 %v289_v43, %v285_v44 }
  0x8f   : > { %v238_v32 = vadd.f32 %v237_v28, %v227_v27  ;;  %v267_v35 = vpop.permute.xlu0 %266 }
  0x90   : > { %v269_v36 = vsel %vm214_vm2, 0.0, %v267_v35 }
  0x91   : > { %v248_v38 = vadd.f32 %v247_v29, %v238_v32  ;;  %v274_v42 = vmul.f32 %v273_v34, %v269_v36 }
  0x93   : > { %v254_v41 = vadd.f32 %v253_v33, %v248_v38 }
  0x95   : > { %v264_v46 = vadd.f32 %v263_v39, %v254_v41 }
  0x97   : > { %v275_v47 = vadd.f32 %v274_v42, %v264_v46 }
  0x99   : > { %v281_v49 = vadd.f32 %v280_v45, %v275_v47 }
  0x9b   : > { %v291_v51 = vadd.f32 %v290_v48, %v281_v49 }
  0x9d   : > { %v299_v52 = vadd.f32 %v382_v50, %v291_v51 }
  0x9f   : > { %300 = vst [vmem:[%s196_s5] sm:$0xf] %v299_v52 }
  0xa0 PF: > { %s13_s14 = sadd.s32 1, %s433_s14   ;;  %s519_s12 = smov %s429_s13 }
  0xa1   : > { %p10_p5 = scmp.ge.s32.totalorder %s13_s14, 4   ;;  %s520_s13 = smov %s522_s15 }
  0xa3   :  { %12 = sbr.rel (!%p10_p5) target bundleno = 2 (0x2), region = 62 }

</bundles_post_ra>
